<compile_context>
chip_gen: v6e
topology: v6e:2x2x1
jax: 0.10.0
libtpu: 0.0.40
codegen_flags: <defaults>
</compile_context>

<pallas_src>
import functools
import math

import jax
import jax.numpy as jnp
from jax.experimental import pallas as pl
from jax.experimental.pallas import tpu as pltpu


_NEG_INF = -1e30                 # additive causal-mask / m-init value (exp underflows to 0)
_VMEM_LIMIT = 48 * 1024 * 1024   # explicit scoped-VMEM budget (<= v7x 64 MiB physical)


def _layer_norm(v, w, b, eps=1e-5):
    # statistics kept in f32
    mu = jnp.mean(v, axis=-1, keepdims=True)
    var = jnp.mean((v - mu) ** 2, axis=-1, keepdims=True)
    return (v - mu) * jax.lax.rsqrt(var + eps) * w + b


def _choose_tile(dim, max_tile, quantum):
    """Largest tile <= max_tile that exactly divides dim (multiple of quantum), else dim."""
    if dim <= max_tile:
        return dim
    t = (max_tile // quantum) * quantum
    while t >= quantum:
        if dim % t == 0:
            return t
        t -= quantum
    return dim  # fallback: one big block (only hit for awkward shapes)


# --------------------- kernel 1: LN1 + fused QKV, (rows, E) x (E, 3E) ---------------------
# grid = (row_tiles, qkv_col_tiles); LN computed once per row block into bf16 scratch.
def _ln_qkv_kernel(x_ref, ln_w_ref, ln_b_ref, wqkv_ref, bqkv_ref, qkv_ref, h_sc):
    @pl.when(pl.program_id(1) == 0)
    def _():
        h_sc[...] = _layer_norm(x_ref[...], ln_w_ref[0], ln_b_ref[0]).astype(h_sc.dtype)

    # bf16 x bf16 matmul, f32 accumulation; 1/sqrt(hd) already folded into the Q columns.
    qkv_ref[...] = (jnp.dot(h_sc[...], wqkv_ref[...], preferred_element_type=jnp.float32)
                    + bqkv_ref[0]).astype(qkv_ref.dtype)


# --------------------- kernel 2: flash-style causal MHA + out-proj + residual -------------
# grid = (B, q_tiles, kv_tiles); per-head online softmax; all in-kernel ops are 2-D
# (no cross-lane 3-D transposes), Q/K/V taken by static column slices of the QKV slab.
def _attn_kernel(qkv_q_ref, qkv_kv_ref, x_ref, wo_ref, bo_ref, x1_ref,
                 m_sc, l_sc, acc_sc, *, n_head, head_dim, n_embd, t_q, t_kv):
    H, hd, E = n_head, head_dim, n_embd
    qi = pl.program_id(1)
    ki = pl.program_id(2)
    nk = pl.num_programs(2)

    @pl.when(ki == 0)
    def _():
        m_sc[...] = jnp.full(m_sc.shape, _NEG_INF, m_sc.dtype)
        l_sc[...] = jnp.zeros(l_sc.shape, l_sc.dtype)
        acc_sc[...] = jnp.zeros(acc_sc.shape, acc_sc.dtype)

    # Skip KV tiles that lie entirely in the causal future of this q tile (~2x less work).
    @pl.when(ki * t_kv <= qi * t_q + (t_q - 1))
    def _():
        # one 2-D causal mask per (q, kv) tile, shared by every head
        row = qi * t_q + jax.lax.broadcasted_iota(jnp.int32, (t_q, t_kv), 0)
        col = ki * t_kv + jax.lax.broadcasted_iota(jnp.int32, (t_q, t_kv), 1)
        future = col > row

        for h in range(H):  # static unroll; each head uses plain 2-D MXU dots
            q = qkv_q_ref[:, h * hd:(h + 1) * hd].astype(jnp.bfloat16)               # (Tq, hd)
            k = qkv_kv_ref[:, E + h * hd:E + (h + 1) * hd].astype(jnp.bfloat16)      # (Tk, hd)
            v = qkv_kv_ref[:, 2 * E + h * hd:2 * E + (h + 1) * hd].astype(jnp.bfloat16)

            # q @ k^T via NT dot_general; 1/sqrt(hd) already folded into Wq/bq.
            s = jax.lax.dot_general(q, k, (((1,), (1,)), ((), ())),
                                    preferred_element_type=jnp.float32)              # (Tq, Tk)
            s = jnp.where(future, _NEG_INF, s)

            m_prev = m_sc[h]
            m_new = jnp.maximum(m_prev, jnp.max(s, axis=-1, keepdims=True))
            alpha = jnp.exp(m_prev - m_new)
            p = jnp.exp(s - m_new)
            l_sc[h] = alpha * l_sc[h] + jnp.sum(p, axis=-1, keepdims=True)
            acc_sc[h] = alpha * acc_sc[h] + jnp.dot(
                p.astype(jnp.bfloat16), v, preferred_element_type=jnp.float32)
            m_sc[h] = m_new

    @pl.when(ki == nk - 1)
    def _():
        # TODO(synk): attention-weight dropout omitted (eval mode).
        # Normalize, merge heads via block-matmul with the matching Wo row slab,
        # add out-proj bias and the residual -> lane-contiguous (Tq, E) store.
        proj = jnp.zeros((t_q, E), jnp.float32)
        for h in range(H):
            o_h = acc_sc[h] * pl.reciprocal(l_sc[h], approx=True)                    # (Tq, hd)
            proj = proj + jnp.dot(o_h.astype(jnp.bfloat16),
                                  wo_ref[h * hd:(h + 1) * hd, :],
                                  preferred_element_type=jnp.float32)
        x1_ref[...] = (x_ref[...] + proj + bo_ref[0]).astype(x1_ref.dtype)


# --------------------- kernel 3: LN2 + FFN (hidden-tiled) + residual ----------------------
# grid = (row_tiles, hidden_tiles); LN2 once per row block, second matmul accumulated in f32.
def _ffn_kernel(x1_ref, ln2_w_ref, ln2_b_ref, w1_ref, b1_ref, w2_ref, b2_ref,
                o_ref, h2_sc, acc_sc):
    c = pl.program_id(1)

    @pl.when(c == 0)
    def _():
        h2_sc[...] = _layer_norm(x1_ref[...], ln2_w_ref[0], ln2_b_ref[0]).astype(h2_sc.dtype)
        acc_sc[...] = jnp.zeros(acc_sc.shape, acc_sc.dtype)

    ff = jnp.dot(h2_sc[...], w1_ref[...], preferred_element_type=jnp.float32) + b1_ref[0]
    ff = jnp.maximum(ff, 0.0).astype(jnp.bfloat16)
    acc_sc[...] += jnp.dot(ff, w2_ref[...], preferred_element_type=jnp.float32)

    @pl.when(c == pl.num_programs(1) - 1)
    def _():
        # TODO(synk): FFN dropout omitted (eval mode).
        o_ref[...] = (x1_ref[...] + acc_sc[...] + b2_ref[0]).astype(o_ref.dtype)


def decoder_block(x, params, *, n_head):
    """Forward pass of DecoderBlock. x: (B, T, E) float32, batch_first layout."""
    B, T, E = x.shape
    H = n_head
    hd = E // H
    rows = B * T
    f32 = jnp.float32

    rb = _choose_tile(rows, 512, 8)          # row tile of the (B*T, E) slabs
    row_grid = rows // rb
    cb = _choose_tile(3 * E, 512, 128)       # QKV output-column tile
    qkv_col_grid = (3 * E) // cb
    hb = _choose_tile(4 * E, 512, 128)       # FFN hidden tile
    hid_grid = (4 * E) // hb
    tq = _choose_tile(T, 128, 8)             # attention q / kv tiles
    tk = _choose_tile(T, 128, 8)
    nq, nk = T // tq, T // tk

    x2d = x.reshape(rows, E)

    # ---- kernel 1: LN1 + fused QKV (batch folded into M; 3E columns tiled) ----
    qkv2d = pl.pallas_call(
        _ln_qkv_kernel,
        out_shape=jax.ShapeDtypeStruct((rows, 3 * E), f32),
        grid_spec=pltpu.PrefetchScalarGridSpec(
            num_scalar_prefetch=0,
            grid=(row_grid, qkv_col_grid),
            in_specs=[
                pl.BlockSpec((rb, E), lambda r, c: (r, 0)),
                pl.BlockSpec((1, E), lambda r, c: (0, 0)),
                pl.BlockSpec((1, E), lambda r, c: (0, 0)),
                pl.BlockSpec((E, cb), lambda r, c: (0, c)),
                pl.BlockSpec((1, cb), lambda r, c: (0, c)),
            ],
            out_specs=pl.BlockSpec((rb, cb), lambda r, c: (r, c)),
            scratch_shapes=[pltpu.VMEM((rb, E), jnp.bfloat16)],
        ),
        compiler_params=pltpu.CompilerParams(
            dimension_semantics=("parallel", "arbitrary"),
            vmem_limit_bytes=_VMEM_LIMIT),
    )(x2d, params["ln1_w"], params["ln1_b"], params["wqkv_t"], params["bqkv"])

    # ---- kernel 2: flash-style causal attention + out-proj + residual ----
    # qkv2d is passed twice (q-row-blocked and kv-row-blocked views of the same buffer);
    # no head split/merge ever touches HBM.
    attn_kernel = functools.partial(_attn_kernel, n_head=H, head_dim=hd,
                                    n_embd=E, t_q=tq, t_kv=tk)
    x1 = pl.pallas_call(
        attn_kernel,
        out_shape=jax.ShapeDtypeStruct((rows, E), f32),
        grid_spec=pltpu.PrefetchScalarGridSpec(
            num_scalar_prefetch=0,
            grid=(B, nq, nk),
            in_specs=[
                pl.BlockSpec((tq, 3 * E), lambda b, qi, ki: (b * nq + qi, 0)),
                pl.BlockSpec((tk, 3 * E), lambda b, qi, ki: (b * nk + ki, 0)),
                pl.BlockSpec((tq, E), lambda b, qi, ki: (b * nq + qi, 0)),
                pl.BlockSpec((E, E), lambda b, qi, ki: (0, 0)),
                pl.BlockSpec((1, E), lambda b, qi, ki: (0, 0)),
            ],
            out_specs=pl.BlockSpec((tq, E), lambda b, qi, ki: (b * nq + qi, 0)),
            scratch_shapes=[pltpu.VMEM((H, tq, 1), f32),    # running max m
                            pltpu.VMEM((H, tq, 1), f32),    # running denom l
                            pltpu.VMEM((H, tq, hd), f32)],  # running PV accumulator
        ),
        compiler_params=pltpu.CompilerParams(
            dimension_semantics=("parallel", "parallel", "arbitrary"),
            vmem_limit_bytes=_VMEM_LIMIT),
    )(qkv2d, qkv2d, x2d, params["wo_t"], params["bo"])

    # ---- kernel 3: LN2 + FFN (hidden-dim tiled) + residual; output aliases x1 ----
    out2d = pl.pallas_call(
        _ffn_kernel,
        out_shape=jax.ShapeDtypeStruct((rows, E), f32),
        grid_spec=pltpu.PrefetchScalarGridSpec(
            num_scalar_prefetch=0,
            grid=(row_grid, hid_grid),
            in_specs=[
                pl.BlockSpec((rb, E), lambda r, c: (r, 0)),
                pl.BlockSpec((1, E), lambda r, c: (0, 0)),
                pl.BlockSpec((1, E), lambda r, c: (0, 0)),
                pl.BlockSpec((E, hb), lambda r, c: (0, c)),
                pl.BlockSpec((1, hb), lambda r, c: (0, c)),
                pl.BlockSpec((hb, E), lambda r, c: (c, 0)),
                pl.BlockSpec((1, E), lambda r, c: (0, 0)),
            ],
            out_specs=pl.BlockSpec((rb, E), lambda r, c: (r, 0)),
            scratch_shapes=[pltpu.VMEM((rb, E), jnp.bfloat16),   # LN2 output
                            pltpu.VMEM((rb, E), jnp.float32)],   # FFN accumulator
        ),
        input_output_aliases={0: 0},
        compiler_params=pltpu.CompilerParams(
            dimension_semantics=("parallel", "arbitrary"),
            vmem_limit_bytes=_VMEM_LIMIT),
    )(x1, params["ln2_w"], params["ln2_b"], params["w1_t"], params["b1"],
      params["w2_t"], params["b2"])

    return out2d.reshape(B, T, E)


def make_params(key, n_embd, n_head):
    """Deterministic synthetic parameters (PyTorch shapes), pre-packed for the kernels:
    weights stored transposed (W^T) in bf16, QKV fused to (E, 3E), 1/sqrt(hd) folded into Q."""
    E = n_embd
    hd = E // n_head
    std = 0.02
    f32, bf16 = jnp.float32, jnp.bfloat16
    ks = jax.random.split(key, 8)

    # PyTorch-native shapes.
    in_proj_w = std * jax.random.normal(ks[0], (3 * E, E), f32)   # nn.MultiheadAttention
    in_proj_b = std * jax.random.normal(ks[1], (3 * E,), f32)
    wo = std * jax.random.normal(ks[2], (E, E), f32)              # out_proj
    bo = std * jax.random.normal(ks[3], (E,), f32)
    w1 = std * jax.random.normal(ks[4], (4 * E, E), f32)          # FeedFoward.net[0]
    b1 = std * jax.random.normal(ks[5], (4 * E,), f32)
    w2 = std * jax.random.normal(ks[6], (E, 4 * E), f32)          # FeedFoward.net[2]
    b2 = std * jax.random.normal(ks[7], (E,), f32)

    # One-time host-side repacking (PyTorch Linear: y = x @ W.T + b).
    scale = 1.0 / math.sqrt(hd)
    q_scale = jnp.concatenate([jnp.full((E,), scale, f32), jnp.ones((2 * E,), f32)])

    return {
        "ln1_w": jnp.ones((1, E), f32), "ln1_b": jnp.zeros((1, E), f32),
        "wqkv_t": (in_proj_w.T * q_scale[None, :]).astype(bf16),  # (E, 3E), Q pre-scaled
        "bqkv": (in_proj_b * q_scale)[None, :],                   # (1, 3E) f32
        "wo_t": wo.T.astype(bf16), "bo": bo[None, :],
        "ln2_w": jnp.ones((1, E), f32), "ln2_b": jnp.zeros((1, E), f32),
        "w1_t": w1.T.astype(bf16), "b1": b1[None, :],
        "w2_t": w2.T.astype(bf16), "b2": b2[None, :],
    }


def decoder_block_reference(x, params, *, n_head):
    """Pure-JAX f32 reference (same math as the PyTorch module, eval mode)."""
    B, T, E = x.shape
    hd = E // n_head
    f32 = jnp.float32

    def ln(v, w, b):
        mu = v.mean(-1, keepdims=True)
        var = ((v - mu) ** 2).mean(-1, keepdims=True)
        return (v - mu) * jax.lax.rsqrt(var + 1e-5) * w + b

    wqkv = params["wqkv_t"].astype(f32)
    wo = params["wo_t"].astype(f32)
    w1 = params["w1_t"].astype(f32)
    w2 = params["w2_t"].astype(f32)

    h = ln(x, params["ln1_w"][0], params["ln1_b"][0])
    qkv = h @ wqkv + params["bqkv"][0]                            # Q already scaled
    q, k, v = jnp.split(qkv, 3, axis=-1)
    q = q.reshape(B, T, n_head, hd).transpose(0, 2, 1, 3)
    k = k.reshape(B, T, n_head, hd).transpose(0, 2, 1, 3)
    v = v.reshape(B, T, n_head, hd).transpose(0, 2, 1, 3)
    mask = jnp.where(jnp.arange(T)[None, :] > jnp.arange(T)[:, None], _NEG_INF, 0.0)
    s = jnp.einsum("bhtd,bhsd->bhts", q, k) + mask
    p = jax.nn.softmax(s, axis=-1)
    o = jnp.einsum("bhts,bhsd->bhtd", p, v)
    o = o.transpose(0, 2, 1, 3).reshape(B, T, E)
    x1 = x + o @ wo + params["bo"][0]
    h2 = ln(x1, params["ln2_w"][0], params["ln2_b"][0])
    ff = jnp.maximum(h2 @ w1 + params["b1"][0], 0.0)
    ff = ff @ w2 + params["b2"][0]
    return x1 + ff


if __name__ == "__main__":
    # Small shapes consistent with the module: batch=2, block_size(seq)=8, n_embd=32, n_head=4.
    B, T, E, H = 2, 8, 32, 4
    key = jax.random.PRNGKey(0)
    kx, kp = jax.random.split(key)

    x = jax.random.normal(kx, (B, T, E), jnp.float32)
    params = make_params(kp, E, H)

    fwd = jax.jit(functools.partial(decoder_block, n_head=H))
    out = jax.block_until_ready(fwd(x, params))
    assert out.shape == (B, T, E)

    ref = decoder_block_reference(x, params, n_head=H)
    max_err = float(jnp.max(jnp.abs(out - ref)))
    assert max_err < 2e-2, f"max abs err vs reference: {max_err}"

    print("KERNEL_OK")
</pallas_src>

<mosaic_0001>
module attributes {stable_mosaic.version = 11 : i64} {
  func.func @_ln_qkv_kernel(%arg0: i32, %arg1: i32, %arg2: memref<16x32xf32, #tpu.memory_space<vmem>>, %arg3: memref<1x32xf32, #tpu.memory_space<vmem>>, %arg4: memref<1x32xf32, #tpu.memory_space<vmem>>, %arg5: memref<32x96xbf16, #tpu.memory_space<vmem>>, %arg6: memref<1x96xf32, #tpu.memory_space<vmem>>, %arg7: memref<16x96xf32, #tpu.memory_space<vmem>>, %arg8: memref<16x32xbf16, #tpu.memory_space<vmem>>) attributes {dimension_semantics = [#tpu.dimension_semantics<parallel>, #tpu.dimension_semantics<arbitrary>], iteration_bounds = array<i64: 1, 1>, scalar_prefetch = 0 : i64, scratch_operands = 1 : i64, tpu.core_type = #tpu.core_type<tc>, window_params = [{transform_indices = @transform_0, window_bounds = array<i64: 16, 32>}, {pipeline_mode = #tpu.pipeline_mode<synchronous>, transform_indices = @transform_1, window_bounds = array<i64: 1, 32>}, {pipeline_mode = #tpu.pipeline_mode<synchronous>, transform_indices = @transform_2, window_bounds = array<i64: 1, 32>}, {transform_indices = @transform_3, window_bounds = array<i64: 32, 96>}, {transform_indices = @transform_4, window_bounds = array<i64: 1, 96>}, {transform_indices = @transform_5, window_bounds = array<i64: 16, 96>}]} {
    %c0_i32 = arith.constant 0 : i32
    %0 = arith.cmpi eq, %arg1, %c0_i32 : i32
    %1 = arith.extui %0 : i1 to i32
    %c0_i32_0 = arith.constant 0 : i32
    %2 = arith.cmpi ne, %1, %c0_i32_0 : i32
    scf.if %2 {
      %c0_8 = arith.constant 0 : index
      %c0_9 = arith.constant 0 : index
      %12 = vector.load %arg2[%c0_8, %c0_9] : memref<16x32xf32, #tpu.memory_space<vmem>>, vector<16x32xf32>
      %c0_10 = arith.constant 0 : index
      %c0_11 = arith.constant 0 : index
      %13 = vector.load %arg3[%c0_10, %c0_11] : memref<1x32xf32, #tpu.memory_space<vmem>>, vector<1x32xf32>
      %14 = vector.shape_cast %13 : vector<1x32xf32> to vector<32xf32>
      %c0_12 = arith.constant 0 : index
      %c0_13 = arith.constant 0 : index
      %15 = vector.load %arg4[%c0_12, %c0_13] : memref<1x32xf32, #tpu.memory_space<vmem>>, vector<1x32xf32>
      %16 = vector.shape_cast %15 : vector<1x32xf32> to vector<32xf32>
      %cst_14 = arith.constant dense<0.000000e+00> : vector<16xf32>
      %17 = vector.multi_reduction <add>, %12, %cst_14 [1] : vector<16x32xf32> to vector<16xf32>
      %18 = vector.shape_cast %17 : vector<16xf32> to vector<16x1xf32>
      %cst_15 = arith.constant 3.200000e+01 : f32
      %19 = vector.broadcast %cst_15 : f32 to vector<16x1xf32>
      %20 = arith.divf %18, %19 : vector<16x1xf32>
      %21 = vector.broadcast %20 : vector<16x1xf32> to vector<16x32xf32>
      %22 = arith.subf %12, %21 : vector<16x32xf32>
      %23 = arith.mulf %22, %22 : vector<16x32xf32>
      %cst_16 = arith.constant dense<0.000000e+00> : vector<16xf32>
      %24 = vector.multi_reduction <add>, %23, %cst_16 [1] : vector<16x32xf32> to vector<16xf32>
      %25 = vector.shape_cast %24 : vector<16xf32> to vector<16x1xf32>
      %cst_17 = arith.constant 3.200000e+01 : f32
      %26 = vector.broadcast %cst_17 : f32 to vector<16x1xf32>
      %27 = arith.divf %25, %26 : vector<16x1xf32>
      %28 = vector.broadcast %20 : vector<16x1xf32> to vector<16x32xf32>
      %29 = arith.subf %12, %28 : vector<16x32xf32>
      %cst_18 = arith.constant 9.99999974E-6 : f32
      %30 = vector.broadcast %cst_18 : f32 to vector<16x1xf32>
      %31 = arith.addf %27, %30 : vector<16x1xf32>
      %32 = math.rsqrt %31 : vector<16x1xf32>
      %33 = vector.broadcast %32 : vector<16x1xf32> to vector<16x32xf32>
      %34 = arith.mulf %29, %33 : vector<16x32xf32>
      %35 = vector.shape_cast %14 : vector<32xf32> to vector<1x32xf32>
      %36 = vector.broadcast %35 : vector<1x32xf32> to vector<16x32xf32>
      %37 = arith.mulf %34, %36 : vector<16x32xf32>
      %38 = vector.shape_cast %16 : vector<32xf32> to vector<1x32xf32>
      %39 = vector.broadcast %38 : vector<1x32xf32> to vector<16x32xf32>
      %40 = arith.addf %37, %39 : vector<16x32xf32>
      %41 = arith.truncf %40 : vector<16x32xf32> to vector<16x32xbf16>
      %c0_19 = arith.constant 0 : index
      %c0_20 = arith.constant 0 : index
      %42 = vector.load %arg8[%c0_19, %c0_20] : memref<16x32xbf16, #tpu.memory_space<vmem>>, vector<16x32xbf16>
      tpu.vector_store %arg8[%c0_19, %c0_20], %41 {strides = array<i32>} : memref<16x32xbf16, #tpu.memory_space<vmem>>, vector<16x32xbf16>,
    } else {
    }
    %c0 = arith.constant 0 : index
    %c0_1 = arith.constant 0 : index
    %3 = vector.load %arg8[%c0, %c0_1] : memref<16x32xbf16, #tpu.memory_space<vmem>>, vector<16x32xbf16>
    %c0_2 = arith.constant 0 : index
    %c0_3 = arith.constant 0 : index
    %4 = vector.load %arg5[%c0_2, %c0_3] : memref<32x96xbf16, #tpu.memory_space<vmem>>, vector<32x96xbf16>
    %cst = arith.constant dense<0.000000e+00> : vector<16x96xf32>
    %5 = tpu.matmul %3, %4, %cst {dimension_numbers = #tpu.dot_dimension_numbers<[1], [0], [0], [1], [0, 0, 1, 1], [], []>} : vector<16x32xbf16>, vector<32x96xbf16>, vector<16x96xf32> -> vector<16x96xf32>
    %c0_4 = arith.constant 0 : index
    %c0_5 = arith.constant 0 : index
    %6 = vector.load %arg6[%c0_4, %c0_5] : memref<1x96xf32, #tpu.memory_space<vmem>>, vector<1x96xf32>
    %7 = vector.shape_cast %6 : vector<1x96xf32> to vector<96xf32>
    %8 = vector.shape_cast %7 : vector<96xf32> to vector<1x96xf32>
    %9 = vector.broadcast %8 : vector<1x96xf32> to vector<16x96xf32>
    %10 = arith.addf %5, %9 : vector<16x96xf32>
    %c0_6 = arith.constant 0 : index
    %c0_7 = arith.constant 0 : index
    %11 = vector.load %arg7[%c0_6, %c0_7] : memref<16x96xf32, #tpu.memory_space<vmem>>, vector<16x96xf32>
    tpu.vector_store %arg7[%c0_6, %c0_7], %10 {strides = array<i32>} : memref<16x96xf32, #tpu.memory_space<vmem>>, vector<16x96xf32>,
    return
  }
  func.func @transform_0(%arg0: i32, %arg1: i32) -> (i32, i32) {
    %c0_i32 = arith.constant 0 : i32
    %c0_i32_0 = arith.constant 0 : i32
    return %arg0, %c0_i32 : i32, i32
  }
  func.func @transform_1(%arg0: i32, %arg1: i32) -> (i32, i32) {
    %c0_i32 = arith.constant 0 : i32
    %c0_i32_0 = arith.constant 0 : i32
    %c0_i32_1 = arith.constant 0 : i32
    return %c0_i32, %c0_i32_0 : i32, i32
  }
  func.func @transform_2(%arg0: i32, %arg1: i32) -> (i32, i32) {
    %c0_i32 = arith.constant 0 : i32
    %c0_i32_0 = arith.constant 0 : i32
    %c0_i32_1 = arith.constant 0 : i32
    return %c0_i32, %c0_i32_0 : i32, i32
  }
  func.func @transform_3(%arg0: i32, %arg1: i32) -> (i32, i32) {
    %c0_i32 = arith.constant 0 : i32
    %c0_i32_0 = arith.constant 0 : i32
    return %c0_i32, %arg1 : i32, i32
  }
  func.func @transform_4(%arg0: i32, %arg1: i32) -> (i32, i32) {
    %c0_i32 = arith.constant 0 : i32
    %c0_i32_0 = arith.constant 0 : i32
    return %c0_i32, %arg1 : i32, i32
  }
  func.func @transform_5(%arg0: i32, %arg1: i32) -> (i32, i32) {
    %c0_i32 = arith.constant 0 : i32
    return %arg0, %arg1 : i32, i32
  }
}

module attributes {stable_mosaic.version = 11 : i64} {
  func.func @_attn_kernel(%arg0: i32, %arg1: i32, %arg2: i32, %arg3: memref<8x96xf32, #tpu.memory_space<vmem>>, %arg4: memref<8x96xf32, #tpu.memory_space<vmem>>, %arg5: memref<8x32xf32, #tpu.memory_space<vmem>>, %arg6: memref<32x32xbf16, #tpu.memory_space<vmem>>, %arg7: memref<1x32xf32, #tpu.memory_space<vmem>>, %arg8: memref<8x32xf32, #tpu.memory_space<vmem>>, %arg9: memref<4x8x1xf32, #tpu.memory_space<vmem>>, %arg10: memref<4x8x1xf32, #tpu.memory_space<vmem>>, %arg11: memref<4x8x8xf32, #tpu.memory_space<vmem>>) attributes {dimension_semantics = [#tpu.dimension_semantics<parallel>, #tpu.dimension_semantics<parallel>, #tpu.dimension_semantics<arbitrary>], iteration_bounds = array<i64: 2, 1, 1>, scalar_prefetch = 0 : i64, scratch_operands = 3 : i64, tpu.core_type = #tpu.core_type<tc>, window_params = [{transform_indices = @transform_0, window_bounds = array<i64: 8, 96>}, {transform_indices = @transform_1, window_bounds = array<i64: 8, 96>}, {transform_indices = @transform_2, window_bounds = array<i64: 8, 32>}, {pipeline_mode = #tpu.pipeline_mode<synchronous>, transform_indices = @transform_3, window_bounds = array<i64: 32, 32>}, {pipeline_mode = #tpu.pipeline_mode<synchronous>, transform_indices = @transform_4, window_bounds = array<i64: 1, 32>}, {transform_indices = @transform_5, window_bounds = array<i64: 8, 32>}]} {
    %c0_i32 = arith.constant 0 : i32
    %0 = arith.cmpi eq, %arg2, %c0_i32 : i32
    %1 = arith.extui %0 : i1 to i32
    %c0_i32_0 = arith.constant 0 : i32
    %2 = arith.cmpi ne, %1, %c0_i32_0 : i32
    scf.if %2 {
      %cst = arith.constant -1.000000e+30 : f32
      %12 = vector.broadcast %cst : f32 to vector<4x8x1xf32>
      %c0 = arith.constant 0 : index
      %c0_5 = arith.constant 0 : index
      %c0_6 = arith.constant 0 : index
      %13 = vector.load %arg9[%c0, %c0_5, %c0_6] : memref<4x8x1xf32, #tpu.memory_space<vmem>>, vector<4x8x1xf32>
      tpu.vector_store %arg9[%c0, %c0_5, %c0_6], %12 {strides = array<i32>} : memref<4x8x1xf32, #tpu.memory_space<vmem>>, vector<4x8x1xf32>,
      %cst_7 = arith.constant 0.000000e+00 : f32
      %14 = vector.broadcast %cst_7 : f32 to vector<4x8x1xf32>
      %c0_8 = arith.constant 0 : index
      %c0_9 = arith.constant 0 : index
      %c0_10 = arith.constant 0 : index
      %15 = vector.load %arg10[%c0_8, %c0_9, %c0_10] : memref<4x8x1xf32, #tpu.memory_space<vmem>>, vector<4x8x1xf32>
      tpu.vector_store %arg10[%c0_8, %c0_9, %c0_10], %14 {strides = array<i32>} : memref<4x8x1xf32, #tpu.memory_space<vmem>>, vector<4x8x1xf32>,
      %cst_11 = arith.constant 0.000000e+00 : f32
      %16 = vector.broadcast %cst_11 : f32 to vector<4x8x8xf32>
      %c0_12 = arith.constant 0 : index
      %c0_13 = arith.constant 0 : index
      %c0_14 = arith.constant 0 : index
      %17 = vector.load %arg11[%c0_12, %c0_13, %c0_14] : memref<4x8x8xf32, #tpu.memory_space<vmem>>, vector<4x8x8xf32>
      tpu.vector_store %arg11[%c0_12, %c0_13, %c0_14], %16 {strides = array<i32>} : memref<4x8x8xf32, #tpu.memory_space<vmem>>, vector<4x8x8xf32>,
    } else {
    }
    %c8_i32 = arith.constant 8 : i32
    %3 = arith.muli %arg2, %c8_i32 : i32
    %c8_i32_1 = arith.constant 8 : i32
    %4 = arith.muli %arg1, %c8_i32_1 : i32
    %c7_i32 = arith.constant 7 : i32
    %5 = arith.addi %4, %c7_i32 : i32
    %6 = arith.cmpi sle, %3, %5 : i32
    %7 = arith.extui %6 : i1 to i32
    %c0_i32_2 = arith.constant 0 : i32
    %8 = arith.cmpi ne, %7, %c0_i32_2 : i32
    scf.if %8 {
      %c8_i32_5 = arith.constant 8 : i32
      %12 = arith.muli %arg1, %c8_i32_5 : i32
      %13 = tpu.iota {dimensions = array<i32: 0>} : vector<8x8xi32>
      %14 = vector.broadcast %12 : i32 to vector<8x8xi32>
      %15 = arith.addi %14, %13 : vector<8x8xi32>
      %c8_i32_6 = arith.constant 8 : i32
      %16 = arith.muli %arg2, %c8_i32_6 : i32
      %17 = tpu.iota {dimensions = array<i32: 1>} : vector<8x8xi32>
      %18 = vector.broadcast %16 : i32 to vector<8x8xi32>
      %19 = arith.addi %18, %17 : vector<8x8xi32>
      %20 = arith.cmpi sgt, %19, %15 : vector<8x8xi32>
      %c0 = arith.constant 0 : index
      %c0_7 = arith.constant 0 : index
      %21 = vector.load %arg3[%c0, %c0_7] : memref<8x96xf32, #tpu.memory_space<vmem>>, vector<8x8xf32>
      %22 = arith.truncf %21 : vector<8x8xf32> to vector<8x8xbf16>
      %c0_8 = arith.constant 0 : index
      %c32 = arith.constant 32 : index
      %23 = vector.load %arg4[%c0_8, %c32] : memref<8x96xf32, #tpu.memory_space<vmem>>, vector<8x8xf32>
      %24 = arith.truncf %23 : vector<8x8xf32> to vector<8x8xbf16>
      %c0_9 = arith.constant 0 : index
      %c64 = arith.constant 64 : index
      %25 = vector.load %arg4[%c0_9, %c64] : memref<8x96xf32, #tpu.memory_space<vmem>>, vector<8x8xf32>
      %26 = arith.truncf %25 : vector<8x8xf32> to vector<8x8xbf16>
      %cst = arith.constant dense<0.000000e+00> : vector<8x8xf32>
      %27 = tpu.matmul %22, %24, %cst {dimension_numbers = #tpu.dot_dimension_numbers<[1], [1], [0], [0], [0, 0, 1, 0], [], []>} : vector<8x8xbf16>, vector<8x8xbf16>, vector<8x8xf32> -> vector<8x8xf32>
      %cst_10 = arith.constant -1.000000e+30 : f32
      %28 = vector.broadcast %cst_10 : f32 to vector<8x8xf32>
      %29 = arith.select %20, %28, %27 : vector<8x8xi1>, vector<8x8xf32>
      %c0_11 = arith.constant 0 : index
      %c0_12 = arith.constant 0 : index
      %c0_13 = arith.constant 0 : index
      %30 = vector.load %arg9[%c0_11, %c0_12, %c0_13] : memref<4x8x1xf32, #tpu.memory_space<vmem>>, vector<1x8x1xf32>
      %31 = vector.shape_cast %30 : vector<1x8x1xf32> to vector<8x1xf32>
      %cst_14 = arith.constant dense<0xFF800000> : vector<8xf32>
      %32 = vector.multi_reduction <maximumf>, %29, %cst_14 [1] : vector<8x8xf32> to vector<8xf32>
      %33 = vector.shape_cast %32 : vector<8xf32> to vector<8x1xf32>
      %34 = arith.maximumf %31, %33 : vector<8x1xf32>
      %35 = arith.subf %31, %34 : vector<8x1xf32>
      %36 = math.exp %35 : vector<8x1xf32>
      %37 = vector.broadcast %34 : vector<8x1xf32> to vector<8x8xf32>
      %38 = arith.subf %29, %37 : vector<8x8xf32>
      %39 = math.exp %38 : vector<8x8xf32>
      %c0_15 = arith.constant 0 : index
      %c0_16 = arith.constant 0 : index
      %c0_17 = arith.constant 0 : index
      %40 = vector.load %arg10[%c0_15, %c0_16, %c0_17] : memref<4x8x1xf32, #tpu.memory_space<vmem>>, vector<1x8x1xf32>
      %41 = vector.shape_cast %40 : vector<1x8x1xf32> to vector<8x1xf32>
      %42 = arith.mulf %36, %41 : vector<8x1xf32>
      %cst_18 = arith.constant dense<0.000000e+00> : vector<8xf32>
      %43 = vector.multi_reduction <add>, %39, %cst_18 [1] : vector<8x8xf32> to vector<8xf32>
      %44 = vector.shape_cast %43 : vector<8xf32> to vector<8x1xf32>
      %45 = arith.addf %42, %44 : vector<8x1xf32>
      %c0_19 = arith.constant 0 : index
      %c0_20 = arith.constant 0 : index
      %c0_21 = arith.constant 0 : index
      %46 = vector.load %arg10[%c0_19, %c0_20, %c0_21] : memref<4x8x1xf32, #tpu.memory_space<vmem>>, vector<1x8x1xf32>
      %47 = vector.shape_cast %46 : vector<1x8x1xf32> to vector<8x1xf32>
      %48 = vector.shape_cast %45 : vector<8x1xf32> to vector<1x8x1xf32>
      tpu.vector_store %arg10[%c0_19, %c0_20, %c0_21], %48 {strides = array<i32>} : memref<4x8x1xf32, #tpu.memory_space<vmem>>, vector<1x8x1xf32>,
      %c0_22 = arith.constant 0 : index
      %c0_23 = arith.constant 0 : index
      %c0_24 = arith.constant 0 : index
      %49 = vector.load %arg11[%c0_22, %c0_23, %c0_24] : memref<4x8x8xf32, #tpu.memory_space<vmem>>, vector<1x8x8xf32>
      %50 = vector.shape_cast %49 : vector<1x8x8xf32> to vector<8x8xf32>
      %51 = vector.broadcast %36 : vector<8x1xf32> to vector<8x8xf32>
      %52 = arith.mulf %51, %50 : vector<8x8xf32>
      %53 = arith.truncf %39 : vector<8x8xf32> to vector<8x8xbf16>
      %cst_25 = arith.constant dense<0.000000e+00> : vector<8x8xf32>
      %54 = tpu.matmul %53, %26, %cst_25 {dimension_numbers = #tpu.dot_dimension_numbers<[1], [0], [0], [1], [0, 0, 1, 1], [], []>} : vector<8x8xbf16>, vector<8x8xbf16>, vector<8x8xf32> -> vector<8x8xf32>
      %55 = arith.addf %52, %54 : vector<8x8xf32>
      %c0_26 = arith.constant 0 : index
      %c0_27 = arith.constant 0 : index
      %c0_28 = arith.constant 0 : index
      %56 = vector.load %arg11[%c0_26, %c0_27, %c0_28] : memref<4x8x8xf32, #tpu.memory_space<vmem>>, vector<1x8x8xf32>
      %57 = vector.shape_cast %56 : vector<1x8x8xf32> to vector<8x8xf32>
      %58 = vector.shape_cast %55 : vector<8x8xf32> to vector<1x8x8xf32>
      tpu.vector_store %arg11[%c0_26, %c0_27, %c0_28], %58 {strides = array<i32>} : memref<4x8x8xf32, #tpu.memory_space<vmem>>, vector<1x8x8xf32>,
      %c0_29 = arith.constant 0 : index
      %c0_30 = arith.constant 0 : index
      %c0_31 = arith.constant 0 : index
      %59 = vector.load %arg9[%c0_29, %c0_30, %c0_31] : memref<4x8x1xf32, #tpu.memory_space<vmem>>, vector<1x8x1xf32>
      %60 = vector.shape_cast %59 : vector<1x8x1xf32> to vector<8x1xf32>
      %61 = vector.shape_cast %34 : vector<8x1xf32> to vector<1x8x1xf32>
      tpu.vector_store %arg9[%c0_29, %c0_30, %c0_31], %61 {strides = array<i32>} : memref<4x8x1xf32, #tpu.memory_space<vmem>>, vector<1x8x1xf32>,
      %c0_32 = arith.constant 0 : index
      %c8 = arith.constant 8 : index
      %62 = vector.load %arg3[%c0_32, %c8] : memref<8x96xf32, #tpu.memory_space<vmem>>, vector<8x8xf32>
      %63 = arith.truncf %62 : vector<8x8xf32> to vector<8x8xbf16>
      %c0_33 = arith.constant 0 : index
      %c40 = arith.constant 40 : index
      %64 = vector.load %arg4[%c0_33, %c40] : memref<8x96xf32, #tpu.memory_space<vmem>>, vector<8x8xf32>
      %65 = arith.truncf %64 : vector<8x8xf32> to vector<8x8xbf16>
      %c0_34 = arith.constant 0 : index
      %c72 = arith.constant 72 : index
      %66 = vector.load %arg4[%c0_34, %c72] : memref<8x96xf32, #tpu.memory_space<vmem>>, vector<8x8xf32>
      %67 = arith.truncf %66 : vector<8x8xf32> to vector<8x8xbf16>
      %cst_35 = arith.constant dense<0.000000e+00> : vector<8x8xf32>
      %68 = tpu.matmul %63, %65, %cst_35 {dimension_numbers = #tpu.dot_dimension_numbers<[1], [1], [0], [0], [0, 0, 1, 0], [], []>} : vector<8x8xbf16>, vector<8x8xbf16>, vector<8x8xf32> -> vector<8x8xf32>
      %cst_36 = arith.constant -1.000000e+30 : f32
      %69 = vector.broadcast %cst_36 : f32 to vector<8x8xf32>
      %70 = arith.select %20, %69, %68 : vector<8x8xi1>, vector<8x8xf32>
      %c1 = arith.constant 1 : index
      %c0_37 = arith.constant 0 : index
      %c0_38 = arith.constant 0 : index
      %71 = vector.load %arg9[%c1, %c0_37, %c0_38] : memref<4x8x1xf32, #tpu.memory_space<vmem>>, vector<1x8x1xf32>
      %72 = vector.shape_cast %71 : vector<1x8x1xf32> to vector<8x1xf32>
      %cst_39 = arith.constant dense<0xFF800000> : vector<8xf32>
      %73 = vector.multi_reduction <maximumf>, %70, %cst_39 [1] : vector<8x8xf32> to vector<8xf32>
      %74 = vector.shape_cast %73 : vector<8xf32> to vector<8x1xf32>
      %75 = arith.maximumf %72, %74 : vector<8x1xf32>
      %76 = arith.subf %72, %75 : vector<8x1xf32>
      %77 = math.exp %76 : vector<8x1xf32>
      %78 = vector.broadcast %75 : vector<8x1xf32> to vector<8x8xf32>
      %79 = arith.subf %70, %78 : vector<8x8xf32>
      %80 = math.exp %79 : vector<8x8xf32>
      %c1_40 = arith.constant 1 : index
      %c0_41 = arith.constant 0 : index
      %c0_42 = arith.constant 0 : index
      %81 = vector.load %arg10[%c1_40, %c0_41, %c0_42] : memref<4x8x1xf32, #tpu.memory_space<vmem>>, vector<1x8x1xf32>
      %82 = vector.shape_cast %81 : vector<1x8x1xf32> to vector<8x1xf32>
      %83 = arith.mulf %77, %82 : vector<8x1xf32>
      %cst_43 = arith.constant dense<0.000000e+00> : vector<8xf32>
      %84 = vector.multi_reduction <add>, %80, %cst_43 [1] : vector<8x8xf32> to vector<8xf32>
      %85 = vector.shape_cast %84 : vector<8xf32> to vector<8x1xf32>
      %86 = arith.addf %83, %85 : vector<8x1xf32>
      %c1_44 = arith.constant 1 : index
      %c0_45 = arith.constant 0 : index
      %c0_46 = arith.constant 0 : index
      %87 = vector.load %arg10[%c1_44, %c0_45, %c0_46] : memref<4x8x1xf32, #tpu.memory_space<vmem>>, vector<1x8x1xf32>
      %88 = vector.shape_cast %87 : vector<1x8x1xf32> to vector<8x1xf32>
      %89 = vector.shape_cast %86 : vector<8x1xf32> to vector<1x8x1xf32>
      tpu.vector_store %arg10[%c1_44, %c0_45, %c0_46], %89 {strides = array<i32>} : memref<4x8x1xf32, #tpu.memory_space<vmem>>, vector<1x8x1xf32>,
      %c1_47 = arith.constant 1 : index
      %c0_48 = arith.constant 0 : index
      %c0_49 = arith.constant 0 : index
      %90 = vector.load %arg11[%c1_47, %c0_48, %c0_49] : memref<4x8x8xf32, #tpu.memory_space<vmem>>, vector<1x8x8xf32>
      %91 = vector.shape_cast %90 : vector<1x8x8xf32> to vector<8x8xf32>
      %92 = vector.broadcast %77 : vector<8x1xf32> to vector<8x8xf32>
      %93 = arith.mulf %92, %91 : vector<8x8xf32>
      %94 = arith.truncf %80 : vector<8x8xf32> to vector<8x8xbf16>
      %cst_50 = arith.constant dense<0.000000e+00> : vector<8x8xf32>
      %95 = tpu.matmul %94, %67, %cst_50 {dimension_numbers = #tpu.dot_dimension_numbers<[1], [0], [0], [1], [0, 0, 1, 1], [], []>} : vector<8x8xbf16>, vector<8x8xbf16>, vector<8x8xf32> -> vector<8x8xf32>
      %96 = arith.addf %93, %95 : vector<8x8xf32>
      %c1_51 = arith.constant 1 : index
      %c0_52 = arith.constant 0 : index
      %c0_53 = arith.constant 0 : index
      %97 = vector.load %arg11[%c1_51, %c0_52, %c0_53] : memref<4x8x8xf32, #tpu.memory_space<vmem>>, vector<1x8x8xf32>
      %98 = vector.shape_cast %97 : vector<1x8x8xf32> to vector<8x8xf32>
      %99 = vector.shape_cast %96 : vector<8x8xf32> to vector<1x8x8xf32>
      tpu.vector_store %arg11[%c1_51, %c0_52, %c0_53], %99 {strides = array<i32>} : memref<4x8x8xf32, #tpu.memory_space<vmem>>, vector<1x8x8xf32>,
      %c1_54 = arith.constant 1 : index
      %c0_55 = arith.constant 0 : index
      %c0_56 = arith.constant 0 : index
      %100 = vector.load %arg9[%c1_54, %c0_55, %c0_56] : memref<4x8x1xf32, #tpu.memory_space<vmem>>, vector<1x8x1xf32>
      %101 = vector.shape_cast %100 : vector<1x8x1xf32> to vector<8x1xf32>
      %102 = vector.shape_cast %75 : vector<8x1xf32> to vector<1x8x1xf32>
      tpu.vector_store %arg9[%c1_54, %c0_55, %c0_56], %102 {strides = array<i32>} : memref<4x8x1xf32, #tpu.memory_space<vmem>>, vector<1x8x1xf32>,
      %c0_57 = arith.constant 0 : index
      %c16 = arith.constant 16 : index
      %103 = vector.load %arg3[%c0_57, %c16] : memref<8x96xf32, #tpu.memory_space<vmem>>, vector<8x8xf32>
      %104 = arith.truncf %103 : vector<8x8xf32> to vector<8x8xbf16>
      %c0_58 = arith.constant 0 : index
      %c48 = arith.constant 48 : index
      %105 = vector.load %arg4[%c0_58, %c48] : memref<8x96xf32, #tpu.memory_space<vmem>>, vector<8x8xf32>
      %106 = arith.truncf %105 : vector<8x8xf32> to vector<8x8xbf16>
      %c0_59 = arith.constant 0 : index
      %c80 = arith.constant 80 : index
      %107 = vector.load %arg4[%c0_59, %c80] : memref<8x96xf32, #tpu.memory_space<vmem>>, vector<8x8xf32>
      %108 = arith.truncf %107 : vector<8x8xf32> to vector<8x8xbf16>
      %cst_60 = arith.constant dense<0.000000e+00> : vector<8x8xf32>
      %109 = tpu.matmul %104, %106, %cst_60 {dimension_numbers = #tpu.dot_dimension_numbers<[1], [1], [0], [0], [0, 0, 1, 0], [], []>} : vector<8x8xbf16>, vector<8x8xbf16>, vector<8x8xf32> -> vector<8x8xf32>
      %cst_61 = arith.constant -1.000000e+30 : f32
      %110 = vector.broadcast %cst_61 : f32 to vector<8x8xf32>
      %111 = arith.select %20, %110, %109 : vector<8x8xi1>, vector<8x8xf32>
      %c2 = arith.constant 2 : index
      %c0_62 = arith.constant 0 : index
      %c0_63 = arith.constant 0 : index
      %112 = vector.load %arg9[%c2, %c0_62, %c0_63] : memref<4x8x1xf32, #tpu.memory_space<vmem>>, vector<1x8x1xf32>
      %113 = vector.shape_cast %112 : vector<1x8x1xf32> to vector<8x1xf32>
      %cst_64 = arith.constant dense<0xFF800000> : vector<8xf32>
      %114 = vector.multi_reduction <maximumf>, %111, %cst_64 [1] : vector<8x8xf32> to vector<8xf32>
      %115 = vector.shape_cast %114 : vector<8xf32> to vector<8x1xf32>
      %116 = arith.maximumf %113, %115 : vector<8x1xf32>
      %117 = arith.subf %113, %116 : vector<8x1xf32>
      %118 = math.exp %117 : vector<8x1xf32>
      %119 = vector.broadcast %116 : vector<8x1xf32> to vector<8x8xf32>
      %120 = arith.subf %111, %119 : vector<8x8xf32>
      %121 = math.exp %120 : vector<8x8xf32>
      %c2_65 = arith.constant 2 : index
      %c0_66 = arith.constant 0 : index
      %c0_67 = arith.constant 0 : index
      %122 = vector.load %arg10[%c2_65, %c0_66, %c0_67] : memref<4x8x1xf32, #tpu.memory_space<vmem>>, vector<1x8x1xf32>
      %123 = vector.shape_cast %122 : vector<1x8x1xf32> to vector<8x1xf32>
      %124 = arith.mulf %118, %123 : vector<8x1xf32>
      %cst_68 = arith.constant dense<0.000000e+00> : vector<8xf32>
      %125 = vector.multi_reduction <add>, %121, %cst_68 [1] : vector<8x8xf32> to vector<8xf32>
      %126 = vector.shape_cast %125 : vector<8xf32> to vector<8x1xf32>
      %127 = arith.addf %124, %126 : vector<8x1xf32>
      %c2_69 = arith.constant 2 : index
      %c0_70 = arith.constant 0 : index
      %c0_71 = arith.constant 0 : index
      %128 = vector.load %arg10[%c2_69, %c0_70, %c0_71] : memref<4x8x1xf32, #tpu.memory_space<vmem>>, vector<1x8x1xf32>
      %129 = vector.shape_cast %128 : vector<1x8x1xf32> to vector<8x1xf32>
      %130 = vector.shape_cast %127 : vector<8x1xf32> to vector<1x8x1xf32>
      tpu.vector_store %arg10[%c2_69, %c0_70, %c0_71], %130 {strides = array<i32>} : memref<4x8x1xf32, #tpu.memory_space<vmem>>, vector<1x8x1xf32>,
      %c2_72 = arith.constant 2 : index
      %c0_73 = arith.constant 0 : index
      %c0_74 = arith.constant 0 : index
      %131 = vector.load %arg11[%c2_72, %c0_73, %c0_74] : memref<4x8x8xf32, #tpu.memory_space<vmem>>, vector<1x8x8xf32>
      %132 = vector.shape_cast %131 : vector<1x8x8xf32> to vector<8x8xf32>
      %133 = vector.broadcast %118 : vector<8x1xf32> to vector<8x8xf32>
      %134 = arith.mulf %133, %132 : vector<8x8xf32>
      %135 = arith.truncf %121 : vector<8x8xf32> to vector<8x8xbf16>
      %cst_75 = arith.constant dense<0.000000e+00> : vector<8x8xf32>
      %136 = tpu.matmul %135, %108, %cst_75 {dimension_numbers = #tpu.dot_dimension_numbers<[1], [0], [0], [1], [0, 0, 1, 1], [], []>} : vector<8x8xbf16>, vector<8x8xbf16>, vector<8x8xf32> -> vector<8x8xf32>
      %137 = arith.addf %134, %136 : vector<8x8xf32>
      %c2_76 = arith.constant 2 : index
      %c0_77 = arith.constant 0 : index
      %c0_78 = arith.constant 0 : index
      %138 = vector.load %arg11[%c2_76, %c0_77, %c0_78] : memref<4x8x8xf32, #tpu.memory_space<vmem>>, vector<1x8x8xf32>
      %139 = vector.shape_cast %138 : vector<1x8x8xf32> to vector<8x8xf32>
      %140 = vector.shape_cast %137 : vector<8x8xf32> to vector<1x8x8xf32>
      tpu.vector_store %arg11[%c2_76, %c0_77, %c0_78], %140 {strides = array<i32>} : memref<4x8x8xf32, #tpu.memory_space<vmem>>, vector<1x8x8xf32>,
      %c2_79 = arith.constant 2 : index
      %c0_80 = arith.constant 0 : index
      %c0_81 = arith.constant 0 : index
      %141 = vector.load %arg9[%c2_79, %c0_80, %c0_81] : memref<4x8x1xf32, #tpu.memory_space<vmem>>, vector<1x8x1xf32>
      %142 = vector.shape_cast %141 : vector<1x8x1xf32> to vector<8x1xf32>
      %143 = vector.shape_cast %116 : vector<8x1xf32> to vector<1x8x1xf32>
      tpu.vector_store %arg9[%c2_79, %c0_80, %c0_81], %143 {strides = array<i32>} : memref<4x8x1xf32, #tpu.memory_space<vmem>>, vector<1x8x1xf32>,
      %c0_82 = arith.constant 0 : index
      %c24 = arith.constant 24 : index
      %144 = vector.load %arg3[%c0_82, %c24] : memref<8x96xf32, #tpu.memory_space<vmem>>, vector<8x8xf32>
      %145 = arith.truncf %144 : vector<8x8xf32> to vector<8x8xbf16>
      %c0_83 = arith.constant 0 : index
      %c56 = arith.constant 56 : index
      %146 = vector.load %arg4[%c0_83, %c56] : memref<8x96xf32, #tpu.memory_space<vmem>>, vector<8x8xf32>
      %147 = arith.truncf %146 : vector<8x8xf32> to vector<8x8xbf16>
      %c0_84 = arith.constant 0 : index
      %c88 = arith.constant 88 : index
      %148 = vector.load %arg4[%c0_84, %c88] : memref<8x96xf32, #tpu.memory_space<vmem>>, vector<8x8xf32>
      %149 = arith.truncf %148 : vector<8x8xf32> to vector<8x8xbf16>
      %cst_85 = arith.constant dense<0.000000e+00> : vector<8x8xf32>
      %150 = tpu.matmul %145, %147, %cst_85 {dimension_numbers = #tpu.dot_dimension_numbers<[1], [1], [0], [0], [0, 0, 1, 0], [], []>} : vector<8x8xbf16>, vector<8x8xbf16>, vector<8x8xf32> -> vector<8x8xf32>
      %cst_86 = arith.constant -1.000000e+30 : f32
      %151 = vector.broadcast %cst_86 : f32 to vector<8x8xf32>
      %152 = arith.select %20, %151, %150 : vector<8x8xi1>, vector<8x8xf32>
      %c3 = arith.constant 3 : index
      %c0_87 = arith.constant 0 : index
      %c0_88 = arith.constant 0 : index
      %153 = vector.load %arg9[%c3, %c0_87, %c0_88] : memref<4x8x1xf32, #tpu.memory_space<vmem>>, vector<1x8x1xf32>
      %154 = vector.shape_cast %153 : vector<1x8x1xf32> to vector<8x1xf32>
      %cst_89 = arith.constant dense<0xFF800000> : vector<8xf32>
      %155 = vector.multi_reduction <maximumf>, %152, %cst_89 [1] : vector<8x8xf32> to vector<8xf32>
      %156 = vector.shape_cast %155 : vector<8xf32> to vector<8x1xf32>
      %157 = arith.maximumf %154, %156 : vector<8x1xf32>
      %158 = arith.subf %154, %157 : vector<8x1xf32>
      %159 = math.exp %158 : vector<8x1xf32>
      %160 = vector.broadcast %157 : vector<8x1xf32> to vector<8x8xf32>
      %161 = arith.subf %152, %160 : vector<8x8xf32>
      %162 = math.exp %161 : vector<8x8xf32>
      %c3_90 = arith.constant 3 : index
      %c0_91 = arith.constant 0 : index
      %c0_92 = arith.constant 0 : index
      %163 = vector.load %arg10[%c3_90, %c0_91, %c0_92] : memref<4x8x1xf32, #tpu.memory_space<vmem>>, vector<1x8x1xf32>
      %164 = vector.shape_cast %163 : vector<1x8x1xf32> to vector<8x1xf32>
      %165 = arith.mulf %159, %164 : vector<8x1xf32>
      %cst_93 = arith.constant dense<0.000000e+00> : vector<8xf32>
      %166 = vector.multi_reduction <add>, %162, %cst_93 [1] : vector<8x8xf32> to vector<8xf32>
      %167 = vector.shape_cast %166 : vector<8xf32> to vector<8x1xf32>
      %168 = arith.addf %165, %167 : vector<8x1xf32>
      %c3_94 = arith.constant 3 : index
      %c0_95 = arith.constant 0 : index
      %c0_96 = arith.constant 0 : index
      %169 = vector.load %arg10[%c3_94, %c0_95, %c0_96] : memref<4x8x1xf32, #tpu.memory_space<vmem>>, vector<1x8x1xf32>
      %170 = vector.shape_cast %169 : vector<1x8x1xf32> to vector<8x1xf32>
      %171 = vector.shape_cast %168 : vector<8x1xf32> to vector<1x8x1xf32>
      tpu.vector_store %arg10[%c3_94, %c0_95, %c0_96], %171 {strides = array<i32>} : memref<4x8x1xf32, #tpu.memory_space<vmem>>, vector<1x8x1xf32>,
      %c3_97 = arith.constant 3 : index
      %c0_98 = arith.constant 0 : index
      %c0_99 = arith.constant 0 : index
      %172 = vector.load %arg11[%c3_97, %c0_98, %c0_99] : memref<4x8x8xf32, #tpu.memory_space<vmem>>, vector<1x8x8xf32>
      %173 = vector.shape_cast %172 : vector<1x8x8xf32> to vector<8x8xf32>
      %174 = vector.broadcast %159 : vector<8x1xf32> to vector<8x8xf32>
      %175 = arith.mulf %174, %173 : vector<8x8xf32>
      %176 = arith.truncf %162 : vector<8x8xf32> to vector<8x8xbf16>
      %cst_100 = arith.constant dense<0.000000e+00> : vector<8x8xf32>
      %177 = tpu.matmul %176, %149, %cst_100 {dimension_numbers = #tpu.dot_dimension_numbers<[1], [0], [0], [1], [0, 0, 1, 1], [], []>} : vector<8x8xbf16>, vector<8x8xbf16>, vector<8x8xf32> -> vector<8x8xf32>
      %178 = arith.addf %175, %177 : vector<8x8xf32>
      %c3_101 = arith.constant 3 : index
      %c0_102 = arith.constant 0 : index
      %c0_103 = arith.constant 0 : index
      %179 = vector.load %arg11[%c3_101, %c0_102, %c0_103] : memref<4x8x8xf32, #tpu.memory_space<vmem>>, vector<1x8x8xf32>
      %180 = vector.shape_cast %179 : vector<1x8x8xf32> to vector<8x8xf32>
      %181 = vector.shape_cast %178 : vector<8x8xf32> to vector<1x8x8xf32>
      tpu.vector_store %arg11[%c3_101, %c0_102, %c0_103], %181 {strides = array<i32>} : memref<4x8x8xf32, #tpu.memory_space<vmem>>, vector<1x8x8xf32>,
      %c3_104 = arith.constant 3 : index
      %c0_105 = arith.constant 0 : index
      %c0_106 = arith.constant 0 : index
      %182 = vector.load %arg9[%c3_104, %c0_105, %c0_106] : memref<4x8x1xf32, #tpu.memory_space<vmem>>, vector<1x8x1xf32>
      %183 = vector.shape_cast %182 : vector<1x8x1xf32> to vector<8x1xf32>
      %184 = vector.shape_cast %157 : vector<8x1xf32> to vector<1x8x1xf32>
      tpu.vector_store %arg9[%c3_104, %c0_105, %c0_106], %184 {strides = array<i32>} : memref<4x8x1xf32, #tpu.memory_space<vmem>>, vector<1x8x1xf32>,
    } else {
    }
    %c0_i32_3 = arith.constant 0 : i32
    %9 = arith.cmpi eq, %arg2, %c0_i32_3 : i32
    %10 = arith.extui %9 : i1 to i32
    %c0_i32_4 = arith.constant 0 : i32
    %11 = arith.cmpi ne, %10, %c0_i32_4 : i32
    scf.if %11 {
      %cst = arith.constant 0.000000e+00 : f32
      %12 = vector.broadcast %cst : f32 to vector<8x32xf32>
      %c0 = arith.constant 0 : index
      %c0_5 = arith.constant 0 : index
      %c0_6 = arith.constant 0 : index
      %13 = vector.load %arg11[%c0, %c0_5, %c0_6] : memref<4x8x8xf32, #tpu.memory_space<vmem>>, vector<1x8x8xf32>
      %14 = vector.shape_cast %13 : vector<1x8x8xf32> to vector<8x8xf32>
      %c0_7 = arith.constant 0 : index
      %c0_8 = arith.constant 0 : index
      %c0_9 = arith.constant 0 : index
      %15 = vector.load %arg10[%c0_7, %c0_8, %c0_9] : memref<4x8x1xf32, #tpu.memory_space<vmem>>, vector<1x8x1xf32>
      %16 = vector.shape_cast %15 : vector<1x8x1xf32> to vector<8x1xf32>
      %17 = tpu.reciprocal %16 {approx = true} : vector<8x1xf32> -> vector<8x1xf32>
      %18 = vector.broadcast %17 : vector<8x1xf32> to vector<8x8xf32>
      %19 = arith.mulf %14, %18 : vector<8x8xf32>
      %20 = arith.truncf %19 : vector<8x8xf32> to vector<8x8xbf16>
      %c0_10 = arith.constant 0 : index
      %c0_11 = arith.constant 0 : index
      %21 = vector.load %arg6[%c0_10, %c0_11] : memref<32x32xbf16, #tpu.memory_space<vmem>>, vector<8x32xbf16>
      %cst_12 = arith.constant dense<0.000000e+00> : vector<8x32xf32>
      %22 = tpu.matmul %20, %21, %cst_12 {dimension_numbers = #tpu.dot_dimension_numbers<[1], [0], [0], [1], [0, 0, 1, 1], [], []>} : vector<8x8xbf16>, vector<8x32xbf16>, vector<8x32xf32> -> vector<8x32xf32>
      %23 = arith.addf %12, %22 : vector<8x32xf32>
      %c1 = arith.constant 1 : index
      %c0_13 = arith.constant 0 : index
      %c0_14 = arith.constant 0 : index
      %24 = vector.load %arg11[%c1, %c0_13, %c0_14] : memref<4x8x8xf32, #tpu.memory_space<vmem>>, vector<1x8x8xf32>
      %25 = vector.shape_cast %24 : vector<1x8x8xf32> to vector<8x8xf32>
      %c1_15 = arith.constant 1 : index
      %c0_16 = arith.constant 0 : index
      %c0_17 = arith.constant 0 : index
      %26 = vector.load %arg10[%c1_15, %c0_16, %c0_17] : memref<4x8x1xf32, #tpu.memory_space<vmem>>, vector<1x8x1xf32>
      %27 = vector.shape_cast %26 : vector<1x8x1xf32> to vector<8x1xf32>
      %28 = tpu.reciprocal %27 {approx = true} : vector<8x1xf32> -> vector<8x1xf32>
      %29 = vector.broadcast %28 : vector<8x1xf32> to vector<8x8xf32>
      %30 = arith.mulf %25, %29 : vector<8x8xf32>
      %31 = arith.truncf %30 : vector<8x8xf32> to vector<8x8xbf16>
      %c8 = arith.constant 8 : index
      %c0_18 = arith.constant 0 : index
      %32 = vector.load %arg6[%c8, %c0_18] : memref<32x32xbf16, #tpu.memory_space<vmem>>, vector<8x32xbf16>
      %cst_19 = arith.constant dense<0.000000e+00> : vector<8x32xf32>
      %33 = tpu.matmul %31, %32, %cst_19 {dimension_numbers = #tpu.dot_dimension_numbers<[1], [0], [0], [1], [0, 0, 1, 1], [], []>} : vector<8x8xbf16>, vector<8x32xbf16>, vector<8x32xf32> -> vector<8x32xf32>
      %34 = arith.addf %23, %33 : vector<8x32xf32>
      %c2 = arith.constant 2 : index
      %c0_20 = arith.constant 0 : index
      %c0_21 = arith.constant 0 : index
      %35 = vector.load %arg11[%c2, %c0_20, %c0_21] : memref<4x8x8xf32, #tpu.memory_space<vmem>>, vector<1x8x8xf32>
      %36 = vector.shape_cast %35 : vector<1x8x8xf32> to vector<8x8xf32>
      %c2_22 = arith.constant 2 : index
      %c0_23 = arith.constant 0 : index
      %c0_24 = arith.constant 0 : index
      %37 = vector.load %arg10[%c2_22, %c0_23, %c0_24] : memref<4x8x1xf32, #tpu.memory_space<vmem>>, vector<1x8x1xf32>
      %38 = vector.shape_cast %37 : vector<1x8x1xf32> to vector<8x1xf32>
      %39 = tpu.reciprocal %38 {approx = true} : vector<8x1xf32> -> vector<8x1xf32>
      %40 = vector.broadcast %39 : vector<8x1xf32> to vector<8x8xf32>
      %41 = arith.mulf %36, %40 : vector<8x8xf32>
      %42 = arith.truncf %41 : vector<8x8xf32> to vector<8x8xbf16>
      %c16 = arith.constant 16 : index
      %c0_25 = arith.constant 0 : index
      %43 = vector.load %arg6[%c16, %c0_25] : memref<32x32xbf16, #tpu.memory_space<vmem>>, vector<8x32xbf16>
      %cst_26 = arith.constant dense<0.000000e+00> : vector<8x32xf32>
      %44 = tpu.matmul %42, %43, %cst_26 {dimension_numbers = #tpu.dot_dimension_numbers<[1], [0], [0], [1], [0, 0, 1, 1], [], []>} : vector<8x8xbf16>, vector<8x32xbf16>, vector<8x32xf32> -> vector<8x32xf32>
      %45 = arith.addf %34, %44 : vector<8x32xf32>
      %c3 = arith.constant 3 : index
      %c0_27 = arith.constant 0 : index
      %c0_28 = arith.constant 0 : index
      %46 = vector.load %arg11[%c3, %c0_27, %c0_28] : memref<4x8x8xf32, #tpu.memory_space<vmem>>, vector<1x8x8xf32>
      %47 = vector.shape_cast %46 : vector<1x8x8xf32> to vector<8x8xf32>
      %c3_29 = arith.constant 3 : index
      %c0_30 = arith.constant 0 : index
      %c0_31 = arith.constant 0 : index
      %48 = vector.load %arg10[%c3_29, %c0_30, %c0_31] : memref<4x8x1xf32, #tpu.memory_space<vmem>>, vector<1x8x1xf32>
      %49 = vector.shape_cast %48 : vector<1x8x1xf32> to vector<8x1xf32>
      %50 = tpu.reciprocal %49 {approx = true} : vector<8x1xf32> -> vector<8x1xf32>
      %51 = vector.broadcast %50 : vector<8x1xf32> to vector<8x8xf32>
      %52 = arith.mulf %47, %51 : vector<8x8xf32>
      %53 = arith.truncf %52 : vector<8x8xf32> to vector<8x8xbf16>
      %c24 = arith.constant 24 : index
      %c0_32 = arith.constant 0 : index
      %54 = vector.load %arg6[%c24, %c0_32] : memref<32x32xbf16, #tpu.memory_space<vmem>>, vector<8x32xbf16>
      %cst_33 = arith.constant dense<0.000000e+00> : vector<8x32xf32>
      %55 = tpu.matmul %53, %54, %cst_33 {dimension_numbers = #tpu.dot_dimension_numbers<[1], [0], [0], [1], [0, 0, 1, 1], [], []>} : vector<8x8xbf16>, vector<8x32xbf16>, vector<8x32xf32> -> vector<8x32xf32>
      %56 = arith.addf %45, %55 : vector<8x32xf32>
      %c0_34 = arith.constant 0 : index
      %c0_35 = arith.constant 0 : index
      %57 = vector.load %arg5[%c0_34, %c0_35] : memref<8x32xf32, #tpu.memory_space<vmem>>, vector<8x32xf32>
      %58 = arith.addf %57, %56 : vector<8x32xf32>
      %c0_36 = arith.constant 0 : index
      %c0_37 = arith.constant 0 : index
      %59 = vector.load %arg7[%c0_36, %c0_37] : memref<1x32xf32, #tpu.memory_space<vmem>>, vector<1x32xf32>
      %60 = vector.shape_cast %59 : vector<1x32xf32> to vector<32xf32>
      %61 = vector.shape_cast %60 : vector<32xf32> to vector<1x32xf32>
      %62 = vector.broadcast %61 : vector<1x32xf32> to vector<8x32xf32>
      %63 = arith.addf %58, %62 : vector<8x32xf32>
      %c0_38 = arith.constant 0 : index
      %c0_39 = arith.constant 0 : index
      %64 = vector.load %arg8[%c0_38, %c0_39] : memref<8x32xf32, #tpu.memory_space<vmem>>, vector<8x32xf32>
      tpu.vector_store %arg8[%c0_38, %c0_39], %63 {strides = array<i32>} : memref<8x32xf32, #tpu.memory_space<vmem>>, vector<8x32xf32>,
    } else {
    }
    return
  }
  func.func @transform_0(%arg0: i32, %arg1: i32, %arg2: i32) -> (i32, i32) {
    %c1_i32 = arith.constant 1 : i32
    %0 = arith.muli %arg0, %c1_i32 : i32
    %1 = arith.addi %0, %arg1 : i32
    %c0_i32 = arith.constant 0 : i32
    %c0_i32_0 = arith.constant 0 : i32
    return %1, %c0_i32 : i32, i32
  }
  func.func @transform_1(%arg0: i32, %arg1: i32, %arg2: i32) -> (i32, i32) {
    %c1_i32 = arith.constant 1 : i32
    %0 = arith.muli %arg0, %c1_i32 : i32
    %1 = arith.addi %0, %arg2 : i32
    %c0_i32 = arith.constant 0 : i32
    %c0_i32_0 = arith.constant 0 : i32
    return %1, %c0_i32 : i32, i32
  }
  func.func @transform_2(%arg0: i32, %arg1: i32, %arg2: i32) -> (i32, i32) {
    %c1_i32 = arith.constant 1 : i32
    %0 = arith.muli %arg0, %c1_i32 : i32
    %1 = arith.addi %0, %arg1 : i32
    %c0_i32 = arith.constant 0 : i32
    %c0_i32_0 = arith.constant 0 : i32
    return %1, %c0_i32 : i32, i32
  }
  func.func @transform_3(%arg0: i32, %arg1: i32, %arg2: i32) -> (i32, i32) {
    %c0_i32 = arith.constant 0 : i32
    %c0_i32_0 = arith.constant 0 : i32
    %c0_i32_1 = arith.constant 0 : i32
    return %c0_i32, %c0_i32_0 : i32, i32
  }
  func.func @transform_4(%arg0: i32, %arg1: i32, %arg2: i32) -> (i32, i32) {
    %c0_i32 = arith.constant 0 : i32
    %c0_i32_0 = arith.constant 0 : i32
    %c0_i32_1 = arith.constant 0 : i32
    return %c0_i32, %c0_i32_0 : i32, i32
  }
  func.func @transform_5(%arg0: i32, %arg1: i32, %arg2: i32) -> (i32, i32) {
    %c1_i32 = arith.constant 1 : i32
    %0 = arith.muli %arg0, %c1_i32 : i32
    %1 = arith.addi %0, %arg1 : i32
    %c0_i32 = arith.constant 0 : i32
    %c0_i32_0 = arith.constant 0 : i32
    return %1, %c0_i32 : i32, i32
  }
}

module attributes {stable_mosaic.version = 11 : i64} {
  func.func @_ffn_kernel(%arg0: i32, %arg1: i32, %arg2: memref<16x32xf32, #tpu.memory_space<vmem>>, %arg3: memref<1x32xf32, #tpu.memory_space<vmem>>, %arg4: memref<1x32xf32, #tpu.memory_space<vmem>>, %arg5: memref<32x128xbf16, #tpu.memory_space<vmem>>, %arg6: memref<1x128xf32, #tpu.memory_space<vmem>>, %arg7: memref<128x32xbf16, #tpu.memory_space<vmem>>, %arg8: memref<1x32xf32, #tpu.memory_space<vmem>>, %arg9: memref<16x32xf32, #tpu.memory_space<vmem>>, %arg10: memref<16x32xbf16, #tpu.memory_space<vmem>>, %arg11: memref<16x32xf32, #tpu.memory_space<vmem>>) attributes {dimension_semantics = [#tpu.dimension_semantics<parallel>, #tpu.dimension_semantics<arbitrary>], iteration_bounds = array<i64: 1, 1>, scalar_prefetch = 0 : i64, scratch_operands = 2 : i64, tpu.core_type = #tpu.core_type<tc>, window_params = [{transform_indices = @transform_0, window_bounds = array<i64: 16, 32>}, {pipeline_mode = #tpu.pipeline_mode<synchronous>, transform_indices = @transform_1, window_bounds = array<i64: 1, 32>}, {pipeline_mode = #tpu.pipeline_mode<synchronous>, transform_indices = @transform_2, window_bounds = array<i64: 1, 32>}, {transform_indices = @transform_3, window_bounds = array<i64: 32, 128>}, {transform_indices = @transform_4, window_bounds = array<i64: 1, 128>}, {transform_indices = @transform_5, window_bounds = array<i64: 128, 32>}, {pipeline_mode = #tpu.pipeline_mode<synchronous>, transform_indices = @transform_6, window_bounds = array<i64: 1, 32>}, {transform_indices = @transform_7, window_bounds = array<i64: 16, 32>}]} {
    %c0_i32 = arith.constant 0 : i32
    %0 = arith.cmpi eq, %arg1, %c0_i32 : i32
    %1 = arith.extui %0 : i1 to i32
    %c0_i32_0 = arith.constant 0 : i32
    %2 = arith.cmpi ne, %1, %c0_i32_0 : i32
    scf.if %2 {
      %c0_16 = arith.constant 0 : index
      %c0_17 = arith.constant 0 : index
      %22 = vector.load %arg2[%c0_16, %c0_17] : memref<16x32xf32, #tpu.memory_space<vmem>>, vector<16x32xf32>
      %c0_18 = arith.constant 0 : index
      %c0_19 = arith.constant 0 : index
      %23 = vector.load %arg3[%c0_18, %c0_19] : memref<1x32xf32, #tpu.memory_space<vmem>>, vector<1x32xf32>
      %24 = vector.shape_cast %23 : vector<1x32xf32> to vector<32xf32>
      %c0_20 = arith.constant 0 : index
      %c0_21 = arith.constant 0 : index
      %25 = vector.load %arg4[%c0_20, %c0_21] : memref<1x32xf32, #tpu.memory_space<vmem>>, vector<1x32xf32>
      %26 = vector.shape_cast %25 : vector<1x32xf32> to vector<32xf32>
      %cst_22 = arith.constant dense<0.000000e+00> : vector<16xf32>
      %27 = vector.multi_reduction <add>, %22, %cst_22 [1] : vector<16x32xf32> to vector<16xf32>
      %28 = vector.shape_cast %27 : vector<16xf32> to vector<16x1xf32>
      %cst_23 = arith.constant 3.200000e+01 : f32
      %29 = vector.broadcast %cst_23 : f32 to vector<16x1xf32>
      %30 = arith.divf %28, %29 : vector<16x1xf32>
      %31 = vector.broadcast %30 : vector<16x1xf32> to vector<16x32xf32>
      %32 = arith.subf %22, %31 : vector<16x32xf32>
      %33 = arith.mulf %32, %32 : vector<16x32xf32>
      %cst_24 = arith.constant dense<0.000000e+00> : vector<16xf32>
      %34 = vector.multi_reduction <add>, %33, %cst_24 [1] : vector<16x32xf32> to vector<16xf32>
      %35 = vector.shape_cast %34 : vector<16xf32> to vector<16x1xf32>
      %cst_25 = arith.constant 3.200000e+01 : f32
      %36 = vector.broadcast %cst_25 : f32 to vector<16x1xf32>
      %37 = arith.divf %35, %36 : vector<16x1xf32>
      %38 = vector.broadcast %30 : vector<16x1xf32> to vector<16x32xf32>
      %39 = arith.subf %22, %38 : vector<16x32xf32>
      %cst_26 = arith.constant 9.99999974E-6 : f32
      %40 = vector.broadcast %cst_26 : f32 to vector<16x1xf32>
      %41 = arith.addf %37, %40 : vector<16x1xf32>
      %42 = math.rsqrt %41 : vector<16x1xf32>
      %43 = vector.broadcast %42 : vector<16x1xf32> to vector<16x32xf32>
      %44 = arith.mulf %39, %43 : vector<16x32xf32>
      %45 = vector.shape_cast %24 : vector<32xf32> to vector<1x32xf32>
      %46 = vector.broadcast %45 : vector<1x32xf32> to vector<16x32xf32>
      %47 = arith.mulf %44, %46 : vector<16x32xf32>
      %48 = vector.shape_cast %26 : vector<32xf32> to vector<1x32xf32>
      %49 = vector.broadcast %48 : vector<1x32xf32> to vector<16x32xf32>
      %50 = arith.addf %47, %49 : vector<16x32xf32>
      %51 = arith.truncf %50 : vector<16x32xf32> to vector<16x32xbf16>
      %c0_27 = arith.constant 0 : index
      %c0_28 = arith.constant 0 : index
      %52 = vector.load %arg10[%c0_27, %c0_28] : memref<16x32xbf16, #tpu.memory_space<vmem>>, vector<16x32xbf16>
      tpu.vector_store %arg10[%c0_27, %c0_28], %51 {strides = array<i32>} : memref<16x32xbf16, #tpu.memory_space<vmem>>, vector<16x32xbf16>,
      %cst_29 = arith.constant 0.000000e+00 : f32
      %53 = vector.broadcast %cst_29 : f32 to vector<16x32xf32>
      %c0_30 = arith.constant 0 : index
      %c0_31 = arith.constant 0 : index
      %54 = vector.load %arg11[%c0_30, %c0_31] : memref<16x32xf32, #tpu.memory_space<vmem>>, vector<16x32xf32>
      tpu.vector_store %arg11[%c0_30, %c0_31], %53 {strides = array<i32>} : memref<16x32xf32, #tpu.memory_space<vmem>>, vector<16x32xf32>,
    } else {
    }
    %c0 = arith.constant 0 : index
    %c0_1 = arith.constant 0 : index
    %3 = vector.load %arg10[%c0, %c0_1] : memref<16x32xbf16, #tpu.memory_space<vmem>>, vector<16x32xbf16>
    %c0_2 = arith.constant 0 : index
    %c0_3 = arith.constant 0 : index
    %4 = vector.load %arg5[%c0_2, %c0_3] : memref<32x128xbf16, #tpu.memory_space<vmem>>, vector<32x128xbf16>
    %cst = arith.constant dense<0.000000e+00> : vector<16x128xf32>
    %5 = tpu.matmul %3, %4, %cst {dimension_numbers = #tpu.dot_dimension_numbers<[1], [0], [0], [1], [0, 0, 1, 1], [], []>} : vector<16x32xbf16>, vector<32x128xbf16>, vector<16x128xf32> -> vector<16x128xf32>
    %c0_4 = arith.constant 0 : index
    %c0_5 = arith.constant 0 : index
    %6 = vector.load %arg6[%c0_4, %c0_5] : memref<1x128xf32, #tpu.memory_space<vmem>>, vector<1x128xf32>
    %7 = vector.shape_cast %6 : vector<1x128xf32> to vector<128xf32>
    %8 = vector.shape_cast %7 : vector<128xf32> to vector<1x128xf32>
    %9 = vector.broadcast %8 : vector<1x128xf32> to vector<16x128xf32>
    %10 = arith.addf %5, %9 : vector<16x128xf32>
    %cst_6 = arith.constant 0.000000e+00 : f32
    %11 = vector.broadcast %cst_6 : f32 to vector<16x128xf32>
    %12 = arith.maximumf %10, %11 : vector<16x128xf32>
    %13 = arith.truncf %12 : vector<16x128xf32> to vector<16x128xbf16>
    %c0_7 = arith.constant 0 : index
    %c0_8 = arith.constant 0 : index
    %14 = vector.load %arg11[%c0_7, %c0_8] : memref<16x32xf32, #tpu.memory_space<vmem>>, vector<16x32xf32>
    %c0_9 = arith.constant 0 : index
    %c0_10 = arith.constant 0 : index
    %15 = vector.load %arg7[%c0_9, %c0_10] : memref<128x32xbf16, #tpu.memory_space<vmem>>, vector<128x32xbf16>
    %cst_11 = arith.constant dense<0.000000e+00> : vector<16x32xf32>
    %16 = tpu.matmul %13, %15, %cst_11 {dimension_numbers = #tpu.dot_dimension_numbers<[1], [0], [0], [1], [0, 0, 1, 1], [], []>} : vector<16x128xbf16>, vector<128x32xbf16>, vector<16x32xf32> -> vector<16x32xf32>
    %17 = arith.addf %14, %16 : vector<16x32xf32>
    %c0_12 = arith.constant 0 : index
    %c0_13 = arith.constant 0 : index
    %18 = vector.load %arg11[%c0_12, %c0_13] : memref<16x32xf32, #tpu.memory_space<vmem>>, vector<16x32xf32>
    tpu.vector_store %arg11[%c0_12, %c0_13], %17 {strides = array<i32>} : memref<16x32xf32, #tpu.memory_space<vmem>>, vector<16x32xf32>,
    %c0_i32_14 = arith.constant 0 : i32
    %19 = arith.cmpi eq, %arg1, %c0_i32_14 : i32
    %20 = arith.extui %19 : i1 to i32
    %c0_i32_15 = arith.constant 0 : i32
    %21 = arith.cmpi ne, %20, %c0_i32_15 : i32
    scf.if %21 {
      %c0_16 = arith.constant 0 : index
      %c0_17 = arith.constant 0 : index
      %22 = vector.load %arg2[%c0_16, %c0_17] : memref<16x32xf32, #tpu.memory_space<vmem>>, vector<16x32xf32>
      %c0_18 = arith.constant 0 : index
      %c0_19 = arith.constant 0 : index
      %23 = vector.load %arg11[%c0_18, %c0_19] : memref<16x32xf32, #tpu.memory_space<vmem>>, vector<16x32xf32>
      %24 = arith.addf %22, %23 : vector<16x32xf32>
      %c0_20 = arith.constant 0 : index
      %c0_21 = arith.constant 0 : index
      %25 = vector.load %arg8[%c0_20, %c0_21] : memref<1x32xf32, #tpu.memory_space<vmem>>, vector<1x32xf32>
      %26 = vector.shape_cast %25 : vector<1x32xf32> to vector<32xf32>
      %27 = vector.shape_cast %26 : vector<32xf32> to vector<1x32xf32>
      %28 = vector.broadcast %27 : vector<1x32xf32> to vector<16x32xf32>
      %29 = arith.addf %24, %28 : vector<16x32xf32>
      %c0_22 = arith.constant 0 : index
      %c0_23 = arith.constant 0 : index
      %30 = vector.load %arg9[%c0_22, %c0_23] : memref<16x32xf32, #tpu.memory_space<vmem>>, vector<16x32xf32>
      tpu.vector_store %arg9[%c0_22, %c0_23], %29 {strides = array<i32>} : memref<16x32xf32, #tpu.memory_space<vmem>>, vector<16x32xf32>,
    } else {
    }
    return
  }
  func.func @transform_0(%arg0: i32, %arg1: i32) -> (i32, i32) {
    %c0_i32 = arith.constant 0 : i32
    %c0_i32_0 = arith.constant 0 : i32
    return %arg0, %c0_i32 : i32, i32
  }
  func.func @transform_1(%arg0: i32, %arg1: i32) -> (i32, i32) {
    %c0_i32 = arith.constant 0 : i32
    %c0_i32_0 = arith.constant 0 : i32
    %c0_i32_1 = arith.constant 0 : i32
    return %c0_i32, %c0_i32_0 : i32, i32
  }
  func.func @transform_2(%arg0: i32, %arg1: i32) -> (i32, i32) {
    %c0_i32 = arith.constant 0 : i32
    %c0_i32_0 = arith.constant 0 : i32
    %c0_i32_1 = arith.constant 0 : i32
    return %c0_i32, %c0_i32_0 : i32, i32
  }
  func.func @transform_3(%arg0: i32, %arg1: i32) -> (i32, i32) {
    %c0_i32 = arith.constant 0 : i32
    %c0_i32_0 = arith.constant 0 : i32
    return %c0_i32, %arg1 : i32, i32
  }
  func.func @transform_4(%arg0: i32, %arg1: i32) -> (i32, i32) {
    %c0_i32 = arith.constant 0 : i32
    %c0_i32_0 = arith.constant 0 : i32
    return %c0_i32, %arg1 : i32, i32
  }
  func.func @transform_5(%arg0: i32, %arg1: i32) -> (i32, i32) {
    %c0_i32 = arith.constant 0 : i32
    %c0_i32_0 = arith.constant 0 : i32
    return %arg1, %c0_i32 : i32, i32
  }
  func.func @transform_6(%arg0: i32, %arg1: i32) -> (i32, i32) {
    %c0_i32 = arith.constant 0 : i32
    %c0_i32_0 = arith.constant 0 : i32
    %c0_i32_1 = arith.constant 0 : i32
    return %c0_i32, %c0_i32_0 : i32, i32
  }
  func.func @transform_7(%arg0: i32, %arg1: i32) -> (i32, i32) {
    %c0_i32 = arith.constant 0 : i32
    %c0_i32_0 = arith.constant 0 : i32
    return %arg0, %c0_i32 : i32, i32
  }
}

</mosaic_0001>

<bundles_post_ra>
// kernel: decoder_block.5
= control target key start
LH: loop header
LB: loop body
LE: loop exit
PB: predicated region body
PF: predicated region fallthrough
CT: control target
= control target key end

     0   :  { %vm35_vm0 = vcmask 261120   ;;  %v382_v15 = vmov 0.0   ;;  %vm383_vm1 = vmmov 0   ;;  %vm87_vm2 = vcmask 257024   ;;  %s499_s0 = inlined_call_operand.vmem [shape: f32[16,32], index: 0, kind: input, shape index: {}, may-alias: {0,7}]   ;;  %s500_s3 = inlined_call_operand.vmem [shape: bf16[32,128], index: 3, kind: input, shape index: {}]   ;;  %s501_s5 = inlined_call_operand.vmem [shape: bf16[128,32], index: 5, kind: input, shape index: {}]   ;;  %s502_s1 = inlined_call_operand.vmem [shape: f32[1,32], index: 1, kind: input, shape index: {}]   ;;  %s503_s2 = inlined_call_operand.vmem [shape: f32[1,32], index: 2, kind: input, shape index: {}]   ;;  %s504_s4 = inlined_call_operand.vmem [shape: f32[1,128], index: 4, kind: input, shape index: {}]   ;;  %s505_s6 = inlined_call_operand.vmem [shape: f32[1,32], index: 6, kind: input, shape index: {}]   ;;  %s506_s7 = inlined_call_operand.vmem [shape: f32[16,32], index: 7, kind: output, shape index: {}, may-alias: {0,7}]  }
   0x1   :  { %v427_v0 = vld [vmem:[%s499_s0] sm:$0xff]  ;;  %v432_v1 = vld [vmem:[%s499_s0 + $0x8] sm:$0xff]  ;;  %337 = vmatprep.subr.bf16.mxu0 %v382_v15  ;;  %90 = vst.msk [vmem:[#allocation3] sm:$0xff] %vm35_vm0, %v382_v15  ;;  %91 = vst.msk [vmem:[#allocation3 + $0x8] sm:$0xff] %vm35_vm0, %v382_v15  ;;  %345 = vmatprep.subr.bf16.mxu1 %v382_v15 }
   0x2   :  { %v36_v2 = vsel %vm35_vm0, %v427_v0, 0.0  ;;  %v39_v3 = vsel %vm35_vm0, %v432_v1, 0.0  ;;  %v367_v14 = vld [vmem:[%s500_s3 + $0x8] sm:$0xff]   ;;  %v368_v16 = vld [vmem:[%s500_s3] sm:$0xff]   ;;  %341 = vmatprep.mubr.msk.bf16.mxu0 %vm383_vm1, %v382_v15  ;;  %361 = vmatprep.mubr.msk.bf16.mxu1 %vm383_vm1, %v382_v15  ;;  %v370_v17 = vld [vmem:[%s501_s5 + $0x38] sm:$0xff]  }
   0x3   :  { %37 = vadd.xlane.f32.xlu0 %v36_v2  ;;  %338 = vmatpush3.bf16.msra.mxu0 %v367_v14  ;;  %v371_v18 = vld [vmem:[%s501_s5 + $0x30] sm:$0xff]   ;;  %v372_v19 = vld [vmem:[%s501_s5 + $0x28] sm:$0xff]   ;;  %v373_v20 = vld [vmem:[%s501_s5 + $0x20] sm:$0xff]  }
   0x4   :  { %339 = vmatprep.subr.bf16.mxu0 %v382_v15  ;;  %346 = vmatpush3.bf16.msra.mxu1 %v370_v17  ;;  %v374_v21 = vld [vmem:[%s501_s5 + $0x18] sm:$0xff]   ;;  %v305_v29 = vld [vmem:[%s502_s1] ss:$0 sm:$0xff]  ;;  %v375_v41 = vld [vmem:[%s501_s5 + $0x10] sm:$0xff]  }
   0x5   :  { %347 = vmatprep.subr.bf16.mxu1 %v382_v15  ;;  %v306_v31 = vld [vmem:[%s503_s2] ss:$0 sm:$0xff]  ;;  %v376_v42 = vld [vmem:[%s501_s5 + $0x8] sm:$0xff]  }
   0x6   :  { %v377_v43 = vld [vmem:[%s501_s5] sm:$0xff]  }
   0x7   :  { %40 = vadd.xlane.f32.xlu0 %v39_v3  ;;  %340 = vmatpush3.bf16.msra.mxu0 %v368_v16  ;;  %v309_v44 = vld [vmem:[%s504_s4] ss:$0 sm:$0xff] }
   0x8   :  { %348 = vmatpush3.bf16.msra.mxu1 %v371_v18  ;;  %v170_v54 = vld [vmem:[#allocation3] sm:$0xff]  ;;  %v171_v58 = vld [vmem:[#allocation3 + $0x8] sm:$0xff]  ;;  %v322_v63 = vld [vmem:[%s505_s6] ss:$0 sm:$0xff] }
   0x9   :  { %349 = vmatprep.subr.bf16.mxu1 %v382_v15 }
   0xc   :  { %350 = vmatpush3.bf16.msra.mxu1 %v372_v19 }
   0xd   :  { %351 = vmatprep.subr.bf16.mxu1 %v382_v15 }
  0x10   :  { %352 = vmatpush3.bf16.msra.mxu1 %v373_v20 }
  0x11   :  { %353 = vmatprep.subr.bf16.mxu1 %v382_v15 }
  0x14   :  { %354 = vmatpush3.bf16.msra.mxu1 %v374_v21 }
  0x15   :  { %355 = vmatprep.subr.bf16.mxu1 %v382_v15 }
  0x18   :  { %356 = vmatpush3.bf16.msra.mxu1 %v375_v41 }
  0x19   :  { %357 = vmatprep.subr.bf16.mxu1 %v382_v15 }
  0x1c   :  { %358 = vmatpush3.bf16.msra.mxu1 %v376_v42 }
  0x1d   :  { %359 = vmatprep.subr.bf16.mxu1 %v382_v15 }
  0x20   :  { %360 = vmatpush3.bf16.msra.mxu1 %v377_v43 }
  0x8c   :  { %v38_v4 = vpop.xlane.xlu0 %37 }
  0x8d   :  { %v43_v5 = vmul.f32 0.03125, %v38_v4 }
  0x8f   :  { %v45_v6 = vsub.f32 %v427_v0, %v43_v5 }
  0x90   :  { %v41_v7 = vpop.xlane.xlu0 %40 }
  0x91   :  { %v44_v8 = vmul.f32 0.03125, %v41_v7  ;;  %v47_v9 = vmul.f32 %v45_v6, %v45_v6 }
  0x93   :  { %v46_v10 = vsub.f32 %v432_v1, %v44_v8  ;;  %v49_v11 = vsel %vm35_vm0, %v47_v9, 0.0 }
  0x94   :  { %50 = vadd.xlane.f32.xlu1 %v49_v11 }
  0x95   :  { %v48_v12 = vmul.f32 %v46_v10, %v46_v10 }
  0x97   :  { %v52_v13 = vsel %vm35_vm0, %v48_v12, 0.0 }
  0x98   :  { %53 = vadd.xlane.f32.xlu1 %v52_v13 }
 0x11d   :  { %v51_v22 = vpop.xlane.xlu1 %50 }
 0x11e   :  { %v55_v23 = vmul.f32 0.03125, %v51_v22 }
 0x120   :  { %v57_v24 = vadd.f32 1e-05, %v55_v23 }
 0x121   :  { %v54_v25 = vpop.xlane.xlu1 %53 }
 0x122   :  { %378 = vrsqrt.f32 %v57_v24  ;;  %v56_v26 = vmul.f32 0.03125, %v54_v25 }
 0x124   :  { %v58_v27 = vadd.f32 1e-05, %v56_v26 }
 0x126   :  { %380 = vrsqrt.f32 %v58_v27 }
 0x12f   :  { %v379_v28 = vpop.eup %378 }
 0x130   :  { %v61_v30 = vmul.f32 %v379_v28, %v45_v6 }
 0x132   :  { %v69_v32 = vmul.f32 %v305_v29, %v61_v30 }
 0x133   :  { %v381_v33 = vpop.eup %380 }
 0x134   :  { %v77_v34 = vadd.f32 %v306_v31, %v69_v32  ;;  %v62_v35 = vmul.f32 %v381_v33, %v46_v10 }
 0x136   :  { %v323_v36 = vpack.c.bf16 %v77_v34, %v77_v34  ;;  %v70_v37 = vmul.f32 %v305_v29, %v62_v35 }
 0x138   :  { %88 = vst.msk [vmem:[#allocation2] sm:$0xf] %vm87_vm2, %v323_v36  ;;  %v78_v38 = vadd.f32 %v306_v31, %v70_v37 }
 0x13a   :  { %v324_v39 = vpack.c.bf16 %v78_v38, %v78_v38 }
 0x13c   :  { %89 = vst.msk [vmem:[#allocation2 + $0x4] sm:$0xf] %vm87_vm2, %v324_v39 }
 0x143   :  { %v369_v40 = vld [vmem:[#allocation2] sm:$0xff]  }
 0x144   :  { %342 = vmatmul.mubr.msk.bf16.vlgmr.msra.gmra.mxu0 %vm35_vm0, %v369_v40 }
 0x204   :  { %v160_v45 = vpop.f32.mrf.mxu0 }
 0x205   :  { %v161_v47 = vadd.f32 %v309_v44, %v160_v45 }
 0x206   :  { %v343_v46 = vpop.f32.mrf.mxu0 }
 0x207   :  { %v167_v51 = vmax.f32 %v161_v47, 0.0 }
 0x208   :  { %v163_v48 = vpop.f32.mrf.mxu0 }
 0x209   :  { %v164_v49 = vadd.f32 %v309_v44, %v163_v48 }
 0x20a   :  { %v344_v50 = vpop.f32.mrf.mxu0 }
 0x20b   :  { %v168_v52 = vmax.f32 %v164_v49, 0.0 }
 0x20d   :  { %v169_v53 = vpack.c.bf16 %v168_v52, %v167_v51 }
 0x20f   :  { %362 = vmatmul.mubr.bf16.vlgmr.msra.gmra.mxu1 %v169_v53 }
 0x2cf   :  { %v270_v55 = vpop.f32.mrf.mxu1 }
 0x2d0   :  { %v277_v56 = vadd.f32 %v270_v55, %v170_v54 }
 0x2d1   :  { %v363_v57 = vpop.f32.mrf.mxu1 }
 0x2d2   :  { %279 = vst.msk [vmem:[#allocation3] sm:$0xff] %vm35_vm0, %v277_v56 }
 0x2d3   :  { %v273_v59 = vpop.f32.mrf.mxu1 }
 0x2d4   :  { %v278_v60 = vadd.f32 %v273_v59, %v171_v58 }
 0x2d5   :  { %v364_v61 = vpop.f32.mrf.mxu1 }
 0x2d6   :  { %280 = vst.msk [vmem:[#allocation3 + $0x8] sm:$0xff] %vm35_vm0, %v278_v60 }
 0x2d9   :  { %v286_v62 = vld [vmem:[#allocation3] sm:$0xff] }
 0x2da   :  { %v288_v2 = vadd.f32 %v286_v62, %v427_v0 }
 0x2dc   :  { %v297_v3 = vadd.f32 %v322_v63, %v288_v2 }
 0x2dd   :  { %v287_v4 = vld [vmem:[#allocation3 + $0x8] sm:$0xff] }
 0x2de   :  { %299 = vst.msk [vmem:[%s506_s7] sm:$0xff] %vm35_vm0, %v297_v3  ;;  %v289_v5 = vadd.f32 %v287_v4, %v432_v1 }
 0x2e0   :  { %v298_v6 = vadd.f32 %v322_v63, %v289_v5 }
 0x2e2   :  { %300 = vst.msk [vmem:[%s506_s7 + $0x8] sm:$0xff] %vm35_vm0, %v298_v6 }

// kernel: decoder_block.3
= control target key start
LH: loop header
LB: loop body
LE: loop exit
PB: predicated region body
PF: predicated region fallthrough
CT: control target
= control target key end

     0   :  { %10 = vsyncpa [#allocation4], 0  ;;  %s237_s18 = smov [#allocation3]   ;;  %s301_s0 = inlined_call_operand.hbm [shape: f32[16,32], index: 0, kind: input, shape index: {}]   ;;  %s302_s1 = inlined_call_operand.vmem [shape: f32[1,32], index: 1, kind: input, shape index: {}]   ;;  %s303_s2 = inlined_call_operand.vmem [shape: f32[1,32], index: 2, kind: input, shape index: {}]   ;;  %s304_s3 = inlined_call_operand.vmem [shape: bf16[32,96], index: 3, kind: input, shape index: {}]   ;;  %s305_s4 = inlined_call_operand.vmem [shape: f32[1,96], index: 4, kind: input, shape index: {}]   ;;  %s306_s5 = inlined_call_operand.vmem [shape: f32[16,96], index: 5, kind: output, shape index: {}]  }
   0x1   :  { %s16_s19 = sshll.u32 %s237_s18, 4  ;;  %s17_s19 = int_to_ptr.vmem [resolvable:$true] %s16_s19 }
   0x2   :  { %s223_s20 = scalar_lea.vmem %s17_s19, 256  ;;  %p228_p1 = scmp.lt.s32.totalorder %s17_s19, %s17_s19 }
   0x3   :  { %p224_p0 = scmp.ne.s32.totalorder %s17_s19, %s223_s20  ;;  %p229_p2 = scmp.lt.s32.totalorder %s223_s20, %s223_s20 }
   0x5   :  { %p230_p3 = por %p229_p2, %p228_p1 }
   0x7   :  { %p231_p4 = pnand %p230_p3, %p224_p0 }
   0x9   :  { %234 = shalt.err (!%p231_p4)
}
   0xa   :  { %s238_s21 = smov 128   ;;  %s239_s22 = smov 8  }
   0xb   :  { %22 = dma.hbm_to_vmem [thread:$0]  %s301_s0, 256, %s17_s19, [#allocation4], %s238_s21, %s238_s21, %s239_s22  }
   0xc   :  { %235 = dma.done.wait [#allocation4], 256  }
   0xd   :  { %236 = vsyncadd [#allocation4], 4294967040  ;;  %vm43_vm0 = vcmask 261120   ;;  %v39_v0 = vld [vmem:[#allocation3] sm:$0xff]  ;;  %v40_v1 = vld [vmem:[#allocation3 + $0x8] sm:$0xff]  ;;  %v240_v15 = vmov 0.0  }
   0xe   :  { %v44_v2 = vsel %vm43_vm0, %v39_v0, 0.0  ;;  %v47_v3 = vsel %vm43_vm0, %v40_v1, 0.0  ;;  %v208_v14 = vld [vmem:[%s304_s3 + $0x8] sm:$0xff]   ;;  %195 = vmatprep.subr.bf16.mxu0 %v240_v15  ;;  %vm241_vm1 = vmmov 0   ;;  %v209_v16 = vld [vmem:[%s304_s3] sm:$0xff]   ;;  %vm95_vm2 = vcmask 257024  }
   0xf   :  { %45 = vadd.xlane.f32.xlu0 %v44_v2  ;;  %199 = vmatprep.mubr.msk.bf16.mxu0 %vm241_vm1, %v240_v15  ;;  %v181_v24 = vld [vmem:[%s302_s1] ss:$0 sm:$0xff]  ;;  %vm173_vm3 = vcmask 785408  }
  0x10   :  { %196 = vmatpush3.bf16.msra.mxu0 %v208_v14  ;;  %v182_v26 = vld [vmem:[%s303_s2] ss:$0 sm:$0xff] }
  0x11   :  { %197 = vmatprep.subr.bf16.mxu0 %v240_v15  ;;  %v185_v36 = vld [vmem:[%s305_s4] ss:$0 sm:$0xff] }
  0x13   :  { %48 = vadd.xlane.f32.xlu0 %v47_v3 }
  0x14   :  { %198 = vmatpush3.bf16.msra.mxu0 %v209_v16 }
  0x98   :  { %v46_v4 = vpop.xlane.xlu0 %45 }
  0x99   :  { %v51_v5 = vmul.f32 0.03125, %v46_v4 }
  0x9b   :  { %v53_v6 = vsub.f32 %v39_v0, %v51_v5 }
  0x9c   :  { %v49_v7 = vpop.xlane.xlu0 %48 }
  0x9d   :  { %v52_v8 = vmul.f32 0.03125, %v49_v7  ;;  %v55_v9 = vmul.f32 %v53_v6, %v53_v6 }
  0x9f   :  { %v54_v10 = vsub.f32 %v40_v1, %v52_v8  ;;  %v57_v11 = vsel %vm43_vm0, %v55_v9, 0.0 }
  0xa0   :  { %58 = vadd.xlane.f32.xlu1 %v57_v11 }
  0xa1   :  { %v56_v12 = vmul.f32 %v54_v10, %v54_v10 }
  0xa3   :  { %v60_v13 = vsel %vm43_vm0, %v56_v12, 0.0 }
  0xa4   :  { %61 = vadd.xlane.f32.xlu1 %v60_v13 }
 0x129   :  { %v59_v17 = vpop.xlane.xlu1 %58 }
 0x12a   :  { %v63_v18 = vmul.f32 0.03125, %v59_v17 }
 0x12c   :  { %v65_v19 = vadd.f32 1e-05, %v63_v18 }
 0x12d   :  { %v62_v20 = vpop.xlane.xlu1 %61 }
 0x12e   :  { %211 = vrsqrt.f32 %v65_v19  ;;  %v64_v21 = vmul.f32 0.03125, %v62_v20 }
 0x130   :  { %v66_v22 = vadd.f32 1e-05, %v64_v21 }
 0x132   :  { %213 = vrsqrt.f32 %v66_v22 }
 0x13b   :  { %v212_v23 = vpop.eup %211 }
 0x13c   :  { %v69_v25 = vmul.f32 %v212_v23, %v53_v6 }
 0x13e   :  { %v77_v27 = vmul.f32 %v181_v24, %v69_v25 }
 0x13f   :  { %v214_v28 = vpop.eup %213 }
 0x140   :  { %v85_v29 = vadd.f32 %v182_v26, %v77_v27  ;;  %v70_v30 = vmul.f32 %v214_v28, %v54_v10 }
 0x142   :  { %v190_v31 = vpack.c.bf16 %v85_v29, %v85_v29  ;;  %v78_v32 = vmul.f32 %v181_v24, %v70_v30 }
 0x144   :  { %96 = vst.msk [vmem:[#allocation2] sm:$0xf] %vm95_vm2, %v190_v31  ;;  %v86_v33 = vadd.f32 %v182_v26, %v78_v32 }
 0x146   :  { %v191_v34 = vpack.c.bf16 %v86_v33, %v86_v33 }
 0x148   :  { %97 = vst.msk [vmem:[#allocation2 + $0x4] sm:$0xf] %vm95_vm2, %v191_v34 }
 0x14f   :  { %v210_v35 = vld [vmem:[#allocation2] sm:$0xff]  }
 0x150   :  { %200 = vmatmul.mubr.msk.bf16.vlgmr.msra.gmra.mxu0 %vm43_vm0, %v210_v35 }
 0x210   :  { %v166_v37 = vpop.f32.mrf.mxu0 }
 0x211   :  { %v167_v38 = vadd.f32 %v185_v36, %v166_v37 }
 0x212   :  { %v201_v39 = vpop.f32.mrf.mxu0 }
 0x213   :  { %174 = vst.msk [vmem:[%s306_s5] sm:$0xff] %vm173_vm3, %v167_v38 }
 0x214   :  { %v169_v40 = vpop.f32.mrf.mxu0 }
 0x215   :  { %v170_v41 = vadd.f32 %v185_v36, %v169_v40 }
 0x216   :  { %v202_v42 = vpop.f32.mrf.mxu0 }
 0x217   :  { %175 = vst.msk [vmem:[%s306_s5 + $0x8] sm:$0xff] %vm173_vm3, %v170_v41 }
 0x218   :  { %180 = vsyncpa [#allocation4], 1 }

// kernel: decoder_block.4
= control target key start
LH: loop header
LB: loop body
LE: loop exit
PB: predicated region body
PF: predicated region fallthrough
CT: control target
= control target key end

     0   :  { %s1498_s18 = smov 0   ;;  %s1500_s19 = smov 0   ;;  %s1719_s0 = inlined_call_operand.vmem [shape: f32[16,96], index: 0, kind: input, shape index: {}, may-alias: {0,1}]   ;;  %s1720_s1 = inlined_call_operand.vmem [shape: f32[16,96], index: 1, kind: input, shape index: {}, may-alias: {0,1}]   ;;  %s1721_s2 = inlined_call_operand.vmem [shape: f32[16,32], index: 2, kind: input, shape index: {}]   ;;  %s1722_s3 = inlined_call_operand.vmem [shape: bf16[32,32], index: 3, kind: input, shape index: {}]   ;;  %s1723_s4 = inlined_call_operand.vmem [shape: f32[1,32], index: 4, kind: input, shape index: {}]   ;;  %s1724_s5 = inlined_call_operand.vmem [shape: f32[16,32], index: 5, kind: output, shape index: {}]  }
   0x1   :  { %s1502_s20 = smov 0  }
   0x2 LB: > { %s34_s21 = sadd.s32 1, %s1447_s19  ;;  %p1248_p0 = scmp.ge.s32.totalorder %s1451_s20, 1  ;;  %s1451_s20 = sphi %s1502_s20, %s15_s20   ;;  %s1447_s19 = sphi %s1500_s19, %s1726_s19   ;;  %s1443_s18 = sphi %s1498_s18, %s1725_s18  }
   0x3   : > { %p36_p1 = scmp.ge.s32.totalorder %s34_s21, 2  ;;  %p237_p2 = scmp.lt.s32.totalorder %s1451_s20, 3 }
   0x5   : > { %s1728_s21 = smov (%p36_p1, %s34_s21), 0  ;;  %p238_p3 = pnand %p1248_p0, %p237_p2 }
   0x6   : > { %p276_p4 = scmp.lt.s32.totalorder (!%p238_p3), %s1443_s18, 1  ;;  %s1455_s26 = smov (!%p238_p3), 96  }
   0x7   : > { %241 = sbr.rel (%p238_p3) target bundleno = 1612 (0x64c), region = 40  ;;  %s1458_s30 = smov (!%p238_p3), 64  }
   0x8   : > { %s1459_s6 = smov (!%p238_p3), 88   ;;  %s1460_s7 = smov (!%p238_p3), 120  }
   0x9   : > { %s1461_s8 = smov (!%p238_p3), 80   ;;  %s1462_s9 = smov (!%p238_p3), 112  }
   0xa   : > { %s1463_s10 = smov (!%p238_p3), 72   ;;  %s1464_s11 = smov (!%p238_p3), 104  }
   0xb   : > { %s1465_s12 = smov (!%p238_p3), 56   ;;  %s1466_s13 = smov (!%p238_p3), 40  }
   0xc   : > { %vm313_vm0 = vcmask 64512   ;;  %v1453_v0 = vmov 0.0   ;;  %vm1454_vm1 = vmmov 0   ;;  %s1730_s18 = smov (!%p276_p4, %s1443_s18), 1  ;;  %vm304_vm2 = vcmask 7168   ;;  %s1467_s14 = smov 48  }
   0xd   : > { %1292 = vmatprep.subr.bf16.mxu0 %v1453_v0  ;;  %314 = vst.msk [vmem:[#allocation4] sm:$0xff] %vm313_vm0, %v1453_v0  ;;  %315 = vst.msk [vmem:[#allocation4 + $0x8] sm:$0xff] %vm313_vm0, %v1453_v0  ;;  %1294 = vmatprep.mubr.msk.bf16.mxu0 %vm1454_vm1, %v1453_v0  ;;  %s1530_s22 = sshll.u32 %s1730_s18, 3  ;;  %v1456_v7 = vmov -1e+30   ;;  %v325_v8 = vlaneseq  ;;  %v1457_v17 = vmov 0  }
   0xe   : > { %316 = vst.msk [vmem:[#allocation4 + $0x10] sm:$0xff] %vm313_vm0, %v1453_v0  ;;  %317 = vst.msk [vmem:[#allocation4 + $0x18] sm:$0xff] %vm313_vm0, %v1453_v0  ;;  %1298 = vmatprep.subr.bf16.mxu1 %v1453_v0  ;;  %1300 = vmatprep.mubr.msk.bf16.mxu1 %vm1454_vm1, %v1453_v0  ;;  %s285_s25 = scalar_lea.vmem %s1720_s1, %s1530_s22  ;;  %s279_s29 = scalar_lea.vmem %s1719_s0, %s1530_s22  ;;  %vm426_vm4 = vcmask 1043456   ;;  %vm1150_vm5 = vcmask 261120  }
   0xf   : > { %v336_v1 = vld [vmem:[%s285_s25] sm:$0xff]  ;;  %305 = vst.msk [vmem:[#allocation2] sm:$0xff] %vm304_vm2, %v1456_v7  ;;  %306 = vst.msk [vmem:[#allocation2 + $0x8] sm:$0xff] %vm304_vm2, %v1456_v7  ;;  %v1560_v9 = vshrl.u32 %v325_v8, 7  ;;  %v1562_v10 = vand.u32 127, %v325_v8  ;;  %1403 = vset.pattern.permute.xlu1 %v1457_v17  ;;  %1404 = vset.pattern.permute.xlu0 %v1457_v17 }
  0x10   : > { %v1536_v2 = vpack.c.bf16 %v336_v1, %v336_v1  ;;  %v334_v5 = vld [vmem:[%s279_s29] sm:$0xff]  ;;  %307 = vst.msk [vmem:[#allocation2 + $0x10] sm:$0xff] %vm304_vm2, %v1456_v7  ;;  %308 = vst.msk [vmem:[#allocation2 + $0x18] sm:$0xff] %vm304_vm2, %v1456_v7  ;;  %s291_s29 = scalar_lea.vmem %s1721_s2, %s1530_s22 }
  0x11   : > { %v335_v6 = vpack.c.bf16 %v334_v5, %v334_v5  ;;  %309 = vst.msk [vmem:[#allocation3] sm:$0xff] %vm304_vm2, %v1453_v0  ;;  %310 = vst.msk [vmem:[#allocation3 + $0x8] sm:$0xff] %vm304_vm2, %v1453_v0  ;;  %vm333_vm3 = vcmp.gt.s32.totalorder %v1562_v10, %v1560_v9 }
  0x12   : > { %339 = vrot.lane.b32.xlu0 %v1536_v2, %s1455_s26  ;;  %311 = vst.msk [vmem:[#allocation3 + $0x10] sm:$0xff] %vm304_vm2, %v1453_v0  ;;  %312 = vst.msk [vmem:[#allocation3 + $0x18] sm:$0xff] %vm304_vm2, %v1453_v0 }
  0x16   : > { %v1570_v18 = vld [vmem:[#allocation2] sm:$0xff]  ;;  %v1622_v60 = vld [vmem:[#allocation2 + $0x8] sm:$0xff] }
  0x17   : > { %v1627_v1 = vld [vmem:[#allocation2 + $0x10] sm:$0xff] }
  0x84   : > { %v340_v3 = vpop.permute.xlu0 %339 }
  0x85   : > { %v346_v4 = vsel %vm313_vm0, %v340_v3, 0 }
  0x86   : > { %1293 = vmatpush3.bf16.xpose.msra.mxu0 %v346_v4 }
  0x87   : > { %1310 = vmatprep.subr.bf16.mxu0 %v1453_v0 }
  0x8d   : > { %1295 = vmatmul.mubr.msk.bf16.vlgmr.msra.gmra.mxu0 %vm313_vm0, %v335_v6 }
  0x8e   : > { %1312 = vmatprep.mubr.msk.bf16.mxu0 %vm1454_vm1, %v1453_v0 }
 0x14d   : > { %v382_v11 = vpop.f32.mrf.mxu0 }
 0x14e   : > { %v388_v12 = vsel %vm333_vm3, -1e+30, %v382_v11 }
 0x14f   : > { %v1296_v13 = vpop.f32.mrf.mxu0  ;;  %v390_v14 = vsel %vm313_vm0, %v388_v12, -inf }
 0x150   : > { %391 = vmax.xlane.f32.xlu0 %v390_v14 }
 0x151   : > { %v385_v15 = vpop.f32.mrf.mxu0 }
 0x153   : > { %v1297_v16 = vpop.f32.mrf.mxu0 }
 0x1d9   : > { %v392_v19 = vpop.xlane.xlu0 %391 }
 0x1da   : > { %v1573_v20 = vmax.f32 %v1570_v18, %v392_v19 }
 0x1dc   : > { %v394_v21 = vsub.f32 %v1570_v18, %v1573_v20  ;;  %472 = vst.msk [vmem:[#allocation2] sm:$0xff] %vm304_vm2, %v1573_v20  ;;  %399 = vperm.xlu1 %1403, %v1573_v20  }
 0x1e0   : > { %421 = vrot.lane.b32.xlu1 %v1536_v2, %s1458_s30 }
 0x1e4   : > { %481 = vrot.lane.b32.xlu1 %v1536_v2, %s1459_s6 }
 0x1e8   : > { %478 = vrot.lane.b32.xlu1 %v335_v6, %s1460_s7 }
 0x1ec   : > { %623 = vrot.lane.b32.xlu1 %v1536_v2, %s1461_s8 }
 0x1f0   : > { %620 = vrot.lane.b32.xlu1 %v335_v6, %s1462_s9  ;;  %s297_s9 = scalar_lea.vmem %s1724_s5, %s1530_s22 }
 0x1f4   : > { %765 = vrot.lane.b32.xlu1 %v1536_v2, %s1463_s10 }
 0x1f8   : > { %762 = vrot.lane.b32.xlu1 %v335_v6, %s1464_s11  ;;  %v815_v6 = vld [vmem:[#allocation2 + $0x18] sm:$0xff] }
 0x257   : > { %v400_v22 = vpop.permute.xlu1 %399 }
 0x258   : > { %v402_v23 = vsub.f32 %v388_v12, %v400_v22 }
 0x25a   : > { %v403_v24 = vmul.f32 1.442695, %v402_v23 }
 0x25b   : > { %v422_v25 = vpop.permute.xlu1 %421 }
 0x25c   : > { %1405 = vpow2.f32 %v403_v24  ;;  %v428_v26 = vsel %vm426_vm4, %v422_v25, 0 }
 0x25d   : > { %1299 = vmatpush3.bf16.msra.mxu1 %v428_v26 }
 0x25e   : > { %1304 = vmatprep.subr.bf16.mxu1 %v1453_v0 }
 0x25f   : > { %v482_v27 = vpop.permute.xlu1 %481 }
 0x260   : > { %v487_v30 = vsel %vm313_vm0, %v482_v27, 0 }
 0x263   : > { %v479_v28 = vpop.permute.xlu1 %478 }
 0x267   : > { %v624_v32 = vpop.permute.xlu1 %623 }
 0x268   : > { %v629_v34 = vsel %vm313_vm0, %v624_v32, 0 }
 0x269   : > { %v1586_v29 = vpop.eup %1405 }
 0x26a   : > { %v420_v31 = vpack.c.bf16 %v1586_v29, %v1586_v29  ;;  %v407_v10 = vsel %vm313_vm0, %v1586_v29, 0.0 }
 0x26b   : > { %v621_v33 = vpop.permute.xlu1 %620 }
 0x26c   : > { %1301 = vmatmul.mubr.msk.bf16.vlgmr.msra.gmra.mxu1 %vm313_vm0, %v420_v31 }
 0x26d   : > { %1305 = vmatpush3.bf16.xpose.msra.mxu1 %v487_v30  ;;  %1306 = vmatprep.mubr.msk.bf16.mxu1 %vm1454_vm1, %v1453_v0 }
 0x26e   : > { %1316 = vmatprep.subr.bf16.mxu1 %v1453_v0 }
 0x26f   : > { %v766_v35 = vpop.permute.xlu1 %765 }
 0x270   : > { %v771_v36 = vsel %vm313_vm0, %v766_v35, 0 }
 0x273   : > { %v763_v37 = vpop.permute.xlu1 %762 }
 0x274   : > { %1307 = vmatmul.mubr.msk.bf16.vlgmr.msra.gmra.mxu1 %vm313_vm0, %v479_v28 }
 0x275   : > { %1317 = vmatpush3.bf16.xpose.msra.mxu1 %v629_v34  ;;  %1318 = vmatprep.mubr.msk.bf16.mxu1 %vm1454_vm1, %v1453_v0  ;;  %v395_v34 = vmul.f32 1.442695, %v394_v21  ;;  %v405_v21 = vld [vmem:[#allocation3] sm:$0xff] }
 0x276   : > { %1328 = vmatprep.subr.bf16.mxu1 %v1453_v0 }
 0x27c   : > { %1319 = vmatmul.mubr.msk.bf16.vlgmr.msra.gmra.mxu1 %vm313_vm0, %v621_v33 }
 0x27d   : > { %1329 = vmatpush3.bf16.xpose.msra.mxu1 %v771_v36  ;;  %1330 = vmatprep.mubr.msk.bf16.mxu1 %vm1454_vm1, %v1453_v0 }
 0x27e   : > { %1340 = vmatprep.subr.bf16.mxu1 %v1453_v0 }
 0x284   : > { %1331 = vmatmul.mubr.msk.bf16.vlgmr.msra.gmra.mxu1 %vm313_vm0, %v763_v37 }
 0x285   : > { %1342 = vmatprep.mubr.msk.bf16.mxu1 %vm1454_vm1, %v1453_v0 }
 0x32c   : > { %v1608_v38 = vpop.f32.mrf.mxu1 }
 0x32e   : > { %v1302_v39 = vpop.f32.mrf.mxu1 }
 0x330   : > { %v467_v40 = vpop.f32.mrf.mxu1 }
 0x332   : > { %v1303_v41 = vpop.f32.mrf.mxu1 }
 0x334   : > { %v523_v42 = vpop.f32.mrf.mxu1 }
 0x335   : > { %v529_v43 = vsel %vm333_vm3, -1e+30, %v523_v42 }
 0x336   : > { %v1308_v44 = vpop.f32.mrf.mxu1  ;;  %v532_v45 = vsel %vm313_vm0, %v529_v43, -inf }
 0x337   : > { %533 = vmax.xlane.f32.xlu1 %v532_v45 }
 0x338   : > { %v526_v46 = vpop.f32.mrf.mxu1 }
 0x33a   : > { %v1309_v47 = vpop.f32.mrf.mxu1 }
 0x33c   : > { %v665_v48 = vpop.f32.mrf.mxu1 }
 0x33d   : > { %v671_v49 = vsel %vm333_vm3, -1e+30, %v665_v48  ;;  %v912_v48 = vld [vmem:[%s1722_s3] sm:$0xf] }
 0x33e   : > { %v1320_v50 = vpop.f32.mrf.mxu1  ;;  %v674_v51 = vsel %vm313_vm0, %v671_v49, -inf }
 0x33f   : > { %675 = vmax.xlane.f32.xlu0 %v674_v51  ;;  %v548_v51 = vld [vmem:[#allocation3 + $0x8] sm:$0xff] }
 0x340   : > { %v668_v52 = vpop.f32.mrf.mxu1 }
 0x342   : > { %v1321_v53 = vpop.f32.mrf.mxu1 }
 0x344   : > { %v807_v54 = vpop.f32.mrf.mxu1 }
 0x345   : > { %v813_v55 = vsel %vm333_vm3, -1e+30, %v807_v54 }
 0x346   : > { %v1332_v56 = vpop.f32.mrf.mxu1  ;;  %v816_v57 = vsel %vm313_vm0, %v813_v55, -inf }
 0x347   : > { %817 = vmax.xlane.f32.xlu0 %v816_v57 }
 0x348   : > { %v810_v58 = vpop.f32.mrf.mxu1 }
 0x34a   : > { %v1333_v59 = vpop.f32.mrf.mxu1 }
 0x3c0   : > { %v534_v61 = vpop.xlane.xlu1 %533 }
 0x3c1   : > { %v535_v62 = vmax.f32 %v1622_v60, %v534_v61 }
 0x3c3   : > { %v536_v63 = vsub.f32 %v1622_v60, %v535_v62  ;;  %614 = vst.msk [vmem:[#allocation2 + $0x8] sm:$0xff] %vm304_vm2, %v535_v62  ;;  %541 = vperm.xlu0 %1404, %v535_v62   ;;  %v832_v60 = vld [vmem:[#allocation3 + $0x18] sm:$0xff] }
 0x3c5   : > { %v537_v35 = vmul.f32 1.442695, %v536_v63 }
 0x3c7   : > { %564 = vrot.lane.b32.xlu0 %v1536_v2, %s1465_s12 }
 0x3c8   : > { %v676_v3 = vpop.xlane.xlu0 %675 }
 0x3c9   : > { %v1631_v4 = vmax.f32 %v1627_v1, %v676_v3 }
 0x3cb   : > { %v678_v5 = vsub.f32 %v1627_v1, %v1631_v4  ;;  %756 = vst.msk [vmem:[#allocation2 + $0x10] sm:$0xff] %vm304_vm2, %v1631_v4  ;;  %683 = vperm.xlu1 %1403, %v1631_v4   ;;  %848 = vrot.lane.b32.xlu0 %v1536_v2, %s1466_s13  ;;  %v413_v1 = vld [vmem:[#allocation4] sm:$0xff] }
 0x3cd   : > { %v679_v41 = vmul.f32 1.442695, %v678_v5  ;;  %v925_v5 = vld [vmem:[%s1722_s3 + $0x4] sm:$0xf] }
 0x3d0   : > { %v818_v7 = vpop.xlane.xlu0 %817 }
 0x3d1   : > { %v819_v8 = vmax.f32 %v815_v6, %v818_v7  ;;  %v932_v7 = vsel %vm426_vm4, %v925_v5, 0 }
 0x3d2   : > { %1341 = vmatpush3.bf16.msra.mxu1 %v932_v7 }
 0x3d3   : > { %v820_v9 = vsub.f32 %v815_v6, %v819_v8  ;;  %898 = vst.msk [vmem:[#allocation2 + $0x18] sm:$0xff] %vm304_vm2, %v819_v8  ;;  %825 = vperm.xlu1 %1403, %v819_v8   ;;  %1352 = vmatprep.subr.bf16.mxu1 %v1453_v0 }
 0x3d5   : > { %v821_v40 = vmul.f32 1.442695, %v820_v9 }
 0x3d7   : > { %706 = vrot.lane.b32.xlu1 %v1536_v2, %s1467_s14 }
 0x3ea   : > { %408 = vadd.xlane.f32.xlu0 %v407_v10 }
 0x43e   : > { %v542_v11 = vpop.permute.xlu0 %541 }
 0x43f   : > { %v544_v12 = vsub.f32 %v529_v43, %v542_v11 }
 0x441   : > { %v545_v13 = vmul.f32 1.442695, %v544_v12 }
 0x442   : > { %v565_v14 = vpop.permute.xlu0 %564 }
 0x443   : > { %1407 = vpow2.f32 %v545_v13  ;;  %v570_v15 = vsel %vm426_vm4, %v565_v14, 0 }
 0x444   : > { %1311 = vmatpush3.bf16.msra.mxu0 %v570_v15 }
 0x445   : > { %1322 = vmatprep.subr.bf16.mxu0 %v1453_v0 }
 0x446   : > { %v684_v16 = vpop.permute.xlu1 %683  ;;  %v849_v29 = vpop.permute.xlu0 %848 }
 0x447   : > { %v686_v17 = vsub.f32 %v671_v49, %v684_v16  ;;  %v854_v33 = vsel %vm426_vm4, %v849_v29, 0  ;;  %v978_v49 = vsel %vm426_vm4, %v912_v48, 0 }
 0x449   : > { %v687_v19 = vmul.f32 1.442695, %v686_v17 }
 0x44b   : > { %1409 = vpow2.f32 %v687_v19 }
 0x44e   : > { %v826_v22 = vpop.permute.xlu1 %825 }
 0x44f   : > { %v828_v2 = vsub.f32 %v813_v55, %v826_v22  ;;  %v690_v55 = vld [vmem:[#allocation3 + $0x10] sm:$0xff] }
 0x450   : > { %v1408_v23 = vpop.eup %1407 }
 0x451   : > { %v829_v24 = vmul.f32 1.442695, %v828_v2  ;;  %v550_v25 = vsel %vm313_vm0, %v1408_v23, 0.0  ;;  %v563_v26 = vpack.c.bf16 %v1408_v23, %v1408_v23  ;;  %v556_v2 = vld [vmem:[#allocation4 + $0x8] sm:$0xff] }
 0x452   : > { %551 = vadd.xlane.f32.xlu1 %v550_v25  ;;  %v707_v27 = vpop.permute.xlu1 %706 }
 0x453   : > { %1411 = vpow2.f32 %v829_v24  ;;  %1313 = vmatmul.mubr.msk.bf16.vlgmr.msra.gmra.mxu0 %vm313_vm0, %v563_v26  ;;  %v712_v28 = vsel %vm426_vm4, %v707_v27, 0  ;;  %v698_v27 = vld [vmem:[#allocation4 + $0x10] sm:$0xff] }
 0x454   : > { %1323 = vmatpush3.bf16.msra.mxu0 %v712_v28  ;;  %1324 = vmatprep.mubr.msk.bf16.mxu0 %vm1454_vm1, %v1453_v0  ;;  %1413 = vpow2.f32 %v395_v34 }
 0x455   : > { %1334 = vmatprep.subr.bf16.mxu0 %v1453_v0  ;;  %1415 = vpow2.f32 %v537_v35  ;;  %v840_v35 = vld [vmem:[#allocation4 + $0x18] sm:$0xff] }
 0x456   : > { %1417 = vpow2.f32 %v821_v40 }
 0x457   : > { %1419 = vpow2.f32 %v679_v41 }
 0x458   : > { %v1410_v30 = vpop.eup %1409 }
 0x459   : > { %v692_v31 = vsel %vm313_vm0, %v1410_v30, 0.0  ;;  %v705_v32 = vpack.c.bf16 %v1410_v30, %v1410_v30 }
 0x45a   : > { %693 = vadd.xlane.f32.xlu0 %v692_v31 }
 0x45b   : > { %1325 = vmatmul.mubr.msk.bf16.vlgmr.msra.gmra.mxu0 %vm313_vm0, %v705_v32 }
 0x45c   : > { %1335 = vmatpush3.bf16.msra.mxu0 %v854_v33  ;;  %1336 = vmatprep.mubr.msk.bf16.mxu0 %vm1454_vm1, %v1453_v0 }
 0x45d   : > { %1346 = vmatprep.subr.bf16.mxu0 %v1453_v0 }
 0x460   : > { %v1412_v36 = vpop.eup %1411 }
 0x461   : > { %v834_v37 = vsel %vm313_vm0, %v1412_v36, 0.0  ;;  %v847_v39 = vpack.c.bf16 %v1412_v36, %v1412_v36  ;;  %v1414_v18 = vpop.eup %1413 }
 0x462   : > { %835 = vadd.xlane.f32.xlu1 %v834_v37  ;;  %v1416_v20 = vpop.eup %1415  ;;  %v406_v42 = vmul.f32 %v1414_v18, %v405_v21 }
 0x463   : > { %1337 = vmatmul.mubr.msk.bf16.vlgmr.msra.gmra.mxu0 %vm313_vm0, %v847_v39  ;;  %v1418_v43 = vpop.eup %1417  ;;  %v549_v52 = vmul.f32 %v1416_v20, %v548_v51 }
 0x464   : > { %1348 = vmatprep.mubr.msk.bf16.mxu0 %vm1454_vm1, %v1453_v0  ;;  %v1420_v46 = vpop.eup %1419  ;;  %1347 = vmatpush3.bf16.msra.mxu0 %v978_v49  ;;  %v833_v61 = vmul.f32 %v1418_v43, %v832_v60 }
 0x465   : > { %1358 = vmatprep.subr.bf16.mxu0 %v1453_v0  ;;  %v691_v56 = vmul.f32 %v1420_v46, %v690_v55 }
 0x470   : > { %559 = vperm.xlu0 %1404, %v1416_v20  }
 0x473   : > { %v409_v44 = vpop.xlane.xlu0 %408  ;;  %416 = vperm.xlu1 %1403, %v1414_v18  }
 0x474   : > { %v410_v45 = vadd.f32 %v409_v44, %v406_v42  ;;  %843 = vperm.xlu0 %1404, %v1418_v43   ;;  %v1032_v44 = vld [vmem:[%s1722_s3 + $0x8] sm:$0xf] }
 0x476   : > { %412 = vst.msk [vmem:[#allocation3] sm:$0xff] %vm304_vm2, %v410_v45 }
 0x477   : > { %701 = vperm.xlu1 %1403, %v1420_v46  }
 0x47d   : > { %v903_v47 = vld [vmem:[#allocation3] sm:$0xff] }
 0x47e   : > { %1421 = vrcp.f32 %v903_v47  ;;  %v1037_v47 = vsel %vm426_vm4, %v1032_v44, 0 }
 0x48b   : > { %v1422_v50 = vpop.eup %1421 }
 0x48c   : > { %907 = vperm.xlu0 %1404, %v1422_v50  }
 0x4db   : > { %v552_v53 = vpop.xlane.xlu1 %551 }
 0x4dc   : > { %v553_v54 = vadd.f32 %v552_v53, %v549_v52 }
 0x4de   : > { %554 = vst.msk [vmem:[#allocation3 + $0x8] sm:$0xff] %vm304_vm2, %v553_v54 }
 0x4e3   : > { %v694_v57 = vpop.xlane.xlu0 %693 }
 0x4e4   : > { %v695_v58 = vadd.f32 %v694_v57, %v691_v56 }
 0x4e5   : > { %v916_v59 = vld [vmem:[#allocation3 + $0x8] sm:$0xff] }
 0x4e6   : > { %696 = vst.msk [vmem:[#allocation3 + $0x10] sm:$0xff] %vm304_vm2, %v695_v58  ;;  %1423 = vrcp.f32 %v916_v59 }
 0x4eb   : > { %v836_v62 = vpop.xlane.xlu1 %835  ;;  %v560_v12 = vpop.permute.xlu0 %559 }
 0x4ec   : > { %v837_v63 = vadd.f32 %v836_v62, %v833_v61  ;;  %v562_v23 = vmul.f32 %v560_v12, %v556_v2 }
 0x4ed   : > { %v1023_v3 = vld [vmem:[#allocation3 + $0x10] sm:$0xff] }
 0x4ee   : > { %838 = vst.msk [vmem:[#allocation3 + $0x18] sm:$0xff] %vm304_vm2, %v837_v63  ;;  %1425 = vrcp.f32 %v1023_v3 }
 0x4ef   : > { %v417_v4 = vpop.permute.xlu1 %416  ;;  %v844_v14 = vpop.permute.xlu0 %843 }
 0x4f0   : > { %v419_v6 = vmul.f32 %v417_v4, %v413_v1  ;;  %v846_v39 = vmul.f32 %v844_v14, %v840_v35 }
 0x4f2   : > { %v470_v8 = vadd.f32 %v1608_v38, %v419_v6  ;;  %v1092_v38 = vld [vmem:[%s1722_s3 + $0xc] sm:$0xf] }
 0x4f3   : > { %v1424_v9 = vpop.eup %1423  ;;  %v1097_v22 = vsel %vm426_vm4, %v1092_v38, 0  ;;  %v702_v28 = vpop.permute.xlu1 %701 }
 0x4f4   : > { %471 = vst.msk [vmem:[#allocation4] sm:$0xff] %vm313_vm0, %v470_v8  ;;  %920 = vperm.xlu1 %1403, %v1424_v9   ;;  %v704_v31 = vmul.f32 %v702_v28, %v698_v27  ;;  %v1140_v8 = vld [vmem:[%s291_s29] sm:$0xff] }
 0x4f5   : > { %v1083_v10 = vld [vmem:[#allocation3 + $0x18] sm:$0xff] }
 0x4f6   : > { %1427 = vrcp.f32 %v1083_v10  ;;  %v1265_v10 = vld [vmem:[%s1723_s4] ss:$0 sm:$0xff] }
 0x4fb   : > { %v1426_v11 = vpop.eup %1425  ;;  %v902_v15 = vld [vmem:[#allocation4] sm:$0xff] }
 0x4fc   : > { %1027 = vperm.xlu1 %1403, %v1426_v11  }
 0x503   : > { %v1428_v13 = vpop.eup %1427 }
 0x504   : > { %1087 = vperm.xlu0 %1404, %v1428_v13  }
 0x507   : > { %v908_v16 = vpop.permute.xlu0 %907 }
 0x508   : > { %v910_v17 = vmul.f32 %v908_v16, %v902_v15 }
 0x50a   : > { %v911_v19 = vpack.c.bf16 %v910_v17, %v910_v17 }
 0x50c   : > { %1349 = vmatmul.mubr.msk.bf16.vlgmr.msra.gmra.mxu0 %vm313_vm0, %v911_v19 }
 0x50d   : > { %1359 = vmatpush3.bf16.msra.mxu0 %v1097_v22  ;;  %1360 = vmatprep.mubr.msk.bf16.mxu0 %vm1454_vm1, %v1453_v0 }
 0x513   : > { %v606_v24 = vpop.f32.mrf.mxu0 }
 0x514   : > { %v612_v25 = vadd.f32 %v606_v24, %v562_v23 }
 0x515   : > { %v1314_v26 = vpop.f32.mrf.mxu0 }
 0x516   : > { %613 = vst.msk [vmem:[#allocation4 + $0x8] sm:$0xff] %vm313_vm0, %v612_v25 }
 0x517   : > { %v609_v29 = vpop.f32.mrf.mxu0 }
 0x519   : > { %v1315_v30 = vpop.f32.mrf.mxu0 }
 0x51b   : > { %v748_v32 = vpop.f32.mrf.mxu0 }
 0x51c   : > { %v754_v33 = vadd.f32 %v748_v32, %v704_v31 }
 0x51d   : > { %v1326_v34 = vpop.f32.mrf.mxu0  ;;  %v914_v43 = vld [vmem:[#allocation4 + $0x8] sm:$0xff] }
 0x51e   : > { %755 = vst.msk [vmem:[#allocation4 + $0x10] sm:$0xff] %vm313_vm0, %v754_v33 }
 0x51f   : > { %v751_v36 = vpop.f32.mrf.mxu0 }
 0x521   : > { %v1327_v37 = vpop.f32.mrf.mxu0 }
 0x523   : > { %v890_v40 = vpop.f32.mrf.mxu0 }
 0x524   : > { %v896_v41 = vadd.f32 %v890_v40, %v846_v39 }
 0x525   : > { %v1338_v18 = vpop.f32.mrf.mxu0  ;;  %v1021_v49 = vld [vmem:[#allocation4 + $0x10] sm:$0xff] }
 0x526   : > { %897 = vst.msk [vmem:[#allocation4 + $0x18] sm:$0xff] %vm313_vm0, %v896_v41 }
 0x527   : > { %v893_v20 = vpop.f32.mrf.mxu0 }
 0x529   : > { %v1339_v21 = vpop.f32.mrf.mxu0 }
 0x52d   : > { %v1081_v53 = vld [vmem:[#allocation4 + $0x18] sm:$0xff] }
 0x56f   : > { %v921_v42 = vpop.permute.xlu1 %920 }
 0x570   : > { %v923_v45 = vmul.f32 %v921_v42, %v914_v43 }
 0x572   : > { %v924_v46 = vpack.c.bf16 %v923_v45, %v923_v45 }
 0x574   : > { %1343 = vmatmul.mubr.msk.bf16.vlgmr.msra.gmra.mxu1 %vm313_vm0, %v924_v46 }
 0x575   : > { %1353 = vmatpush3.bf16.msra.mxu1 %v1037_v47  ;;  %1354 = vmatprep.mubr.msk.bf16.mxu1 %vm1454_vm1, %v1453_v0 }
 0x577   : > { %v1028_v48 = vpop.permute.xlu1 %1027 }
 0x578   : > { %v1030_v50 = vmul.f32 %v1028_v48, %v1021_v49 }
 0x57a   : > { %v1031_v51 = vpack.c.bf16 %v1030_v50, %v1030_v50 }
 0x57c   : > { %1355 = vmatmul.mubr.msk.bf16.vlgmr.msra.gmra.mxu1 %vm313_vm0, %v1031_v51 }
 0x57f   : > { %v1088_v52 = vpop.permute.xlu0 %1087 }
 0x580   : > { %v1090_v54 = vmul.f32 %v1088_v52, %v1081_v53 }
 0x582   : > { %v1091_v55 = vpack.c.bf16 %v1090_v54, %v1090_v54 }
 0x584   : > { %1361 = vmatmul.mubr.msk.bf16.vlgmr.msra.gmra.mxu0 %vm313_vm0, %v1091_v55 }
 0x5cc   : > { %v1014_v56 = vpop.f32.mrf.mxu0 }
 0x5ce   : > { %v1350_v57 = vpop.f32.mrf.mxu0 }
 0x5d0   : > { %v1017_v58 = vpop.f32.mrf.mxu0 }
 0x5d2   : > { %v1351_v59 = vpop.f32.mrf.mxu0 }
 0x634   : > { %v968_v60 = vpop.f32.mrf.mxu1 }
 0x635   : > { %v1015_v4 = vadd.f32 %v1014_v56, %v968_v60 }
 0x636   : > { %v1344_v61 = vpop.f32.mrf.mxu1 }
 0x638   : > { %v971_v0 = vpop.f32.mrf.mxu1 }
 0x63a   : > { %v1345_v62 = vpop.f32.mrf.mxu1 }
 0x63c   : > { %v1073_v63 = vpop.f32.mrf.mxu1 }
 0x63d   : > { %v1079_v6 = vadd.f32 %v1073_v63, %v1015_v4 }
 0x63e   : > { %v1356_v1 = vpop.f32.mrf.mxu1 }
 0x640   : > { %v1076_v3 = vpop.f32.mrf.mxu1 }
 0x642   : > { %v1357_v5 = vpop.f32.mrf.mxu1 }
 0x644   : > { %v1133_v7 = vpop.f32.mrf.mxu0 }
 0x645   : > { %v1139_v9 = vadd.f32 %v1133_v7, %v1079_v6 }
 0x646   : > { %v1362_v11 = vpop.f32.mrf.mxu0 }
 0x647   : > { %v1141_v12 = vadd.f32 %v1140_v8, %v1139_v9 }
 0x648   : > { %v1136_v13 = vpop.f32.mrf.mxu0 }
 0x649   : > { %v1149_v14 = vadd.f32 %v1265_v10, %v1141_v12 }
 0x64a   : > { %v1363_v15 = vpop.f32.mrf.mxu0 }
 0x64b   : > { %1151 = vst.msk [vmem:[%s297_s9] sm:$0xff] %vm1150_vm5, %v1149_v14 }
 0x64c PF: > { %s15_s20 = sadd.s32 1, %s1451_s20   ;;  %s1725_s18 = smov %s1447_s19 }
 0x64d   : > { %p12_p5 = scmp.ge.s32.totalorder %s15_s20, 4   ;;  %s1726_s19 = smov %s1728_s21 }
 0x64f   :  { %14 = sbr.rel (!%p12_p5) target bundleno = 2 (0x2), region = 103 }

</bundles_post_ra>
